<compile_context>
chip_gen: v7x
topology: tpu7x:2x2x1
jax: 0.10.0
libtpu: 0.0.40
codegen_flags: <defaults>
</compile_context>

<pallas_src>
import functools

import jax
import jax.numpy as jnp
import numpy as np
from jax import lax
from jax.experimental import pallas as pl
from jax.experimental.pallas import tpu as pltpu


_LANE = 128      # lane width (v6e/v7x MXU is 256-wide: bump to 256 for huge H)
_SUBLANE = 8     # f32 sublane height


def _round_up(x, m):
    return ((x + m - 1) // m) * m


def _pad_to(a, shape):
    pads = [(0, s - d) for d, s in zip(a.shape, shape)]
    return jnp.pad(a, pads)


# ---------------------------------------------------------------------------
# Shared serial recurrence: hid_ref[t] holds the precomputed input projection
# on entry and h_t on exit.  Only h @ W_hh^T + tanh sits on the serial chain.
# ---------------------------------------------------------------------------
def _run_recurrence(hid_ref, whh_ref, h0, n_steps):
    def step(t, h):
        pre = hid_ref[t] + jnp.dot(h, whh_ref[...],
                                   preferred_element_type=jnp.float32)
        h_new = jnp.tanh(pre)
        hid_ref[t] = h_new
        return h_new

    if n_steps <= 32:
        # Fully unrolled straight-line code (LLO scheduler visibility).
        h = h0
        for t in range(n_steps):
            h = step(t, h)
        return h
    return lax.fori_loop(0, n_steps, step, h0)


# ---------------------------------------------------------------------------
# Intermediate RNN layer: emits the hidden slab for the next layer.
# Grid = (batch_shards, time_blocks); hidden state carried in VMEM scratch.
# ---------------------------------------------------------------------------
def _rnn_layer_kernel(x_ref, wih_ref, b_ref, whh_ref, h0_ref, out_ref, h_state):
    # x_ref  : (T, Bs, F)   time block of layer input (time-major, padded)
    # out_ref: (T, Bs, H)   hidden states; also reused as the projection buffer
    T, Bs, F = x_ref.shape
    H = whh_ref.shape[1]

    @pl.when(pl.program_id(1) == 0)          # first time block of this batch shard
    def _():
        h_state[...] = h0_ref[...]

    # Hoisted, bias-folded input projection for the whole block: one big matmul.
    proj = jnp.dot(x_ref[...].reshape(T * Bs, F), wih_ref[...],
                   preferred_element_type=jnp.float32) + b_ref[...]
    out_ref[...] = proj.reshape(T, Bs, H)

    # Serial part: only h @ W_hh^T + tanh per step.
    h_state[...] = _run_recurrence(out_ref, whh_ref, h_state[...], T)


# ---------------------------------------------------------------------------
# Last RNN layer with the FC head fused in (hidden slab stays in VMEM).
# ---------------------------------------------------------------------------
def _rnn_last_layer_fc_kernel(x_ref, wih_ref, b_ref, whh_ref, h0_ref,
                              wfc_ref, bfc_ref, pred_ref, h_state, hid_buf):
    T, Bs, F = x_ref.shape
    H = whh_ref.shape[1]
    O = wfc_ref.shape[1]

    @pl.when(pl.program_id(1) == 0)
    def _():
        h_state[...] = h0_ref[...]

    proj = jnp.dot(x_ref[...].reshape(T * Bs, F), wih_ref[...],
                   preferred_element_type=jnp.float32) + b_ref[...]
    hid_buf[...] = proj.reshape(T, Bs, H)

    h_state[...] = _run_recurrence(hid_buf, whh_ref, h_state[...], T)

    # Fused FC on the whole time block: one (T*Bs, H) x (H, O) matmul.
    pred = jnp.dot(hid_buf[...].reshape(T * Bs, H), wfc_ref[...],
                   preferred_element_type=jnp.float32) + bfc_ref[...]
    pred_ref[...] = pred.reshape(T, Bs, O)


# ---------------------------------------------------------------------------
# pallas_call wrappers
# ---------------------------------------------------------------------------
def _rnn_layer(x_tm, wih_t, bias, whh_t, h0, *, time_block, batch_block):
    S, B, F = x_tm.shape
    H = whh_t.shape[1]
    grid = (B // batch_block, S // time_block)
    # NOTE: weight / bias / h0 blocks have constant index_maps; at production H
    # consider pipeline_mode=pl.Buffered(1) on them to halve their VMEM footprint.
    return pl.pallas_call(
        _rnn_layer_kernel,
        out_shape=jax.ShapeDtypeStruct((S, B, H), jnp.float32),
        grid_spec=pltpu.PrefetchScalarGridSpec(
            num_scalar_prefetch=0,
            grid=grid,
            in_specs=[
                pl.BlockSpec((time_block, batch_block, F), lambda b, t: (t, b, 0)),
                pl.BlockSpec((F, H), lambda b, t: (0, 0)),
                pl.BlockSpec((1, H), lambda b, t: (0, 0)),
                pl.BlockSpec((H, H), lambda b, t: (0, 0)),
                pl.BlockSpec((batch_block, H), lambda b, t: (b, 0)),
            ],
            out_specs=pl.BlockSpec((time_block, batch_block, H),
                                   lambda b, t: (t, b, 0)),
            scratch_shapes=[pltpu.VMEM((batch_block, H), jnp.float32)],
        ),
        compiler_params=pltpu.CompilerParams(
            dimension_semantics=("parallel", "arbitrary"),
        ),
    )(x_tm, wih_t, bias, whh_t, h0)


def _rnn_last_layer_fc(x_tm, wih_t, bias, whh_t, h0, wfc_t, bfc,
                       *, time_block, batch_block):
    S, B, F = x_tm.shape
    H = whh_t.shape[1]
    O = wfc_t.shape[1]
    grid = (B // batch_block, S // time_block)
    return pl.pallas_call(
        _rnn_last_layer_fc_kernel,
        out_shape=jax.ShapeDtypeStruct((S, B, O), jnp.float32),
        grid_spec=pltpu.PrefetchScalarGridSpec(
            num_scalar_prefetch=0,
            grid=grid,
            in_specs=[
                pl.BlockSpec((time_block, batch_block, F), lambda b, t: (t, b, 0)),
                pl.BlockSpec((F, H), lambda b, t: (0, 0)),
                pl.BlockSpec((1, H), lambda b, t: (0, 0)),
                pl.BlockSpec((H, H), lambda b, t: (0, 0)),
                pl.BlockSpec((batch_block, H), lambda b, t: (b, 0)),
                pl.BlockSpec((H, O), lambda b, t: (0, 0)),
                pl.BlockSpec((1, O), lambda b, t: (0, 0)),
            ],
            out_specs=pl.BlockSpec((time_block, batch_block, O),
                                   lambda b, t: (t, b, 0)),
            scratch_shapes=[
                pltpu.VMEM((batch_block, H), jnp.float32),              # h_state
                pltpu.VMEM((time_block, batch_block, H), jnp.float32),  # hidden slab
            ],
        ),
        compiler_params=pltpu.CompilerParams(
            dimension_semantics=("parallel", "arbitrary"),
        ),
    )(x_tm, wih_t, bias, whh_t, h0, wfc_t, bfc)


# ---------------------------------------------------------------------------
# Full module forward
# ---------------------------------------------------------------------------
def rnn_forward(params, x, h, *, time_block=None, batch_block=None):
    """x: (B, S, input_size) batch-first, h: (num_layers, B, H).
    Returns (prediction (B, S, out_size), h) — the module returns the input h."""
    B, S, I = x.shape
    layers = params["rnn_layers"]
    L = len(layers)
    H = layers[0]["w_hh_t"].shape[0]
    O = params["fc_w_t"].shape[1]

    H_pad = _round_up(H, _LANE)
    I_pad = _round_up(I, _LANE)
    O_pad = _round_up(O, _LANE)

    if time_block is None:
        time_block = min(S, 128)
    S_pad = _round_up(S, time_block)

    B_pad = _round_up(B, _SUBLANE)
    if batch_block is None:
        batch_block = min(B_pad, 128)   # shards the batch across the grid / megacore
    B_pad = _round_up(B_pad, batch_block)

    # Batch-first -> time-major, zero-pad to hardware-friendly shapes.
    x_tm = jnp.transpose(x.astype(jnp.float32), (1, 0, 2))
    x_tm = _pad_to(x_tm, (S_pad, B_pad, I_pad))
    h_pad = _pad_to(h.astype(jnp.float32), (L, B_pad, H_pad))

    wfc_t = _pad_to(params["fc_w_t"].astype(jnp.float32), (H_pad, O_pad))
    bfc = _pad_to(params["fc_b"].astype(jnp.float32), (1, O_pad))

    cur = x_tm
    pred_tm = None
    for l, lp in enumerate(layers):
        F_pad = I_pad if l == 0 else H_pad
        wih_t = _pad_to(lp["w_ih_t"].astype(jnp.float32), (F_pad, H_pad))
        whh_t = _pad_to(lp["w_hh_t"].astype(jnp.float32), (H_pad, H_pad))
        bias = _pad_to(lp["bias"].astype(jnp.float32), (1, H_pad))
        if l < L - 1:
            cur = _rnn_layer(cur, wih_t, bias, whh_t, h_pad[l],
                             time_block=time_block, batch_block=batch_block)
        else:
            pred_tm = _rnn_last_layer_fc(cur, wih_t, bias, whh_t, h_pad[l],
                                         wfc_t, bfc,
                                         time_block=time_block,
                                         batch_block=batch_block)

    prediction = jnp.transpose(pred_tm[:S, :B, :O], (1, 0, 2))  # (B, S, out_size)
    return prediction, h


# ---------------------------------------------------------------------------
# Deterministic parameter init (mimics nn.RNN / nn.Linear uniform init shapes)
# ---------------------------------------------------------------------------
def init_params(key, input_size, hidden_size, num_layers, out_size):
    params = {"rnn_layers": []}
    bound = 1.0 / np.sqrt(hidden_size)
    for l in range(num_layers):
        fin = input_size if l == 0 else hidden_size
        key, k1, k2, k3, k4 = jax.random.split(key, 5)
        w_ih = jax.random.uniform(k1, (hidden_size, fin), jnp.float32, -bound, bound)
        w_hh = jax.random.uniform(k2, (hidden_size, hidden_size), jnp.float32, -bound, bound)
        b_ih = jax.random.uniform(k3, (hidden_size,), jnp.float32, -bound, bound)
        b_hh = jax.random.uniform(k4, (hidden_size,), jnp.float32, -bound, bound)
        params["rnn_layers"].append(
            {
                "w_ih_t": w_ih.T,                      # (fin, H)
                "w_hh_t": w_hh.T,                      # (H, H)
                "bias": (b_ih + b_hh).reshape(1, -1),  # (1, H)
            }
        )
    key, k5, k6 = jax.random.split(key, 3)
    fb = 1.0 / np.sqrt(hidden_size)
    fc_w = jax.random.uniform(k5, (out_size, hidden_size), jnp.float32, -fb, fb)
    fc_b = jax.random.uniform(k6, (out_size,), jnp.float32, -fb, fb)
    params["fc_w_t"] = fc_w.T              # (H, O)
    params["fc_b"] = fc_b.reshape(1, -1)   # (1, O)
    return params


# ---------------------------------------------------------------------------
# Pure-JAX reference (sanity check)
# ---------------------------------------------------------------------------
def rnn_forward_ref(params, x, h):
    cur = x  # (B, S, F)
    for layer_idx, lp in enumerate(params["rnn_layers"]):
        def step(h_prev, x_t, lp=lp):
            h_new = jnp.tanh(x_t @ lp["w_ih_t"] + h_prev @ lp["w_hh_t"] + lp["bias"])
            return h_new, h_new

        xs = jnp.transpose(cur, (1, 0, 2))  # (S, B, F)
        _, outs = jax.lax.scan(step, h[layer_idx], xs)
        cur = jnp.transpose(outs, (1, 0, 2))
    pred = cur @ params["fc_w_t"] + params["fc_b"]
    return pred, h


if __name__ == "__main__":
    batch, seq = 2, 8
    input_size, hidden_size, num_layers, out_size = 16, 32, 2, 8

    key = jax.random.PRNGKey(0)
    kx, kh, kp = jax.random.split(key, 3)
    x = jax.random.normal(kx, (batch, seq, input_size), jnp.float32)
    h = jax.random.normal(kh, (num_layers, batch, hidden_size), jnp.float32)
    params = init_params(kp, input_size, hidden_size, num_layers, out_size)

    fwd = jax.jit(functools.partial(rnn_forward, params))
    prediction, h_out = fwd(x, h)
    jax.block_until_ready((prediction, h_out))

    # Sanity check vs. pure-JAX reference.
    pred_ref, _ = rnn_forward_ref(params, x, h)
    np.testing.assert_allclose(np.asarray(prediction), np.asarray(pred_ref),
                               rtol=1e-4, atol=1e-4)
    np.testing.assert_allclose(np.asarray(h_out), np.asarray(h), rtol=0, atol=0)
    assert prediction.shape == (batch, seq, out_size)
    assert h_out.shape == (num_layers, batch, hidden_size)

    print("KERNEL_OK")
</pallas_src>

<mosaic_0001>
module attributes {stable_mosaic.version = 11 : i64} {
  func.func @_rnn_layer_kernel(%arg0: i32, %arg1: i32, %arg2: memref<8x8x128xf32, #tpu.memory_space<vmem>>, %arg3: memref<128x128xf32, #tpu.memory_space<vmem>>, %arg4: memref<1x128xf32, #tpu.memory_space<vmem>>, %arg5: memref<128x128xf32, #tpu.memory_space<vmem>>, %arg6: memref<8x128xf32, #tpu.memory_space<vmem>>, %arg7: memref<8x8x128xf32, #tpu.memory_space<vmem>>, %arg8: memref<8x128xf32, #tpu.memory_space<vmem>>) attributes {dimension_semantics = [#tpu.dimension_semantics<parallel>, #tpu.dimension_semantics<arbitrary>], iteration_bounds = array<i64: 1, 1>, scalar_prefetch = 0 : i64, scratch_operands = 1 : i64, tpu.core_type = #tpu.core_type<tc>, window_params = [{transform_indices = @transform_0, window_bounds = array<i64: 8, 8, 128>}, {pipeline_mode = #tpu.pipeline_mode<synchronous>, transform_indices = @transform_1, window_bounds = array<i64: 128, 128>}, {pipeline_mode = #tpu.pipeline_mode<synchronous>, transform_indices = @transform_2, window_bounds = array<i64: 1, 128>}, {pipeline_mode = #tpu.pipeline_mode<synchronous>, transform_indices = @transform_3, window_bounds = array<i64: 128, 128>}, {transform_indices = @transform_4, window_bounds = array<i64: 8, 128>}, {transform_indices = @transform_5, window_bounds = array<i64: 8, 8, 128>}]} {
    %c0_i32 = arith.constant 0 : i32
    %0 = arith.cmpi eq, %arg1, %c0_i32 : i32
    %1 = arith.extui %0 : i1 to i32
    %c0_i32_0 = arith.constant 0 : i32
    %2 = arith.cmpi ne, %1, %c0_i32_0 : i32
    scf.if %2 {
      %c0_79 = arith.constant 0 : index
      %c0_80 = arith.constant 0 : index
      %86 = vector.load %arg6[%c0_79, %c0_80] : memref<8x128xf32, #tpu.memory_space<vmem>>, vector<8x128xf32>
      %c0_81 = arith.constant 0 : index
      %c0_82 = arith.constant 0 : index
      %87 = vector.load %arg8[%c0_81, %c0_82] : memref<8x128xf32, #tpu.memory_space<vmem>>, vector<8x128xf32>
      tpu.vector_store %arg8[%c0_81, %c0_82], %86 {strides = array<i32>} : memref<8x128xf32, #tpu.memory_space<vmem>>, vector<8x128xf32>,
    } else {
    }
    %c0 = arith.constant 0 : index
    %c0_1 = arith.constant 0 : index
    %c0_2 = arith.constant 0 : index
    %3 = vector.load %arg2[%c0, %c0_1, %c0_2] : memref<8x8x128xf32, #tpu.memory_space<vmem>>, vector<8x8x128xf32>
    %4 = vector.shape_cast %3 : vector<8x8x128xf32> to vector<64x128xf32>
    %c0_3 = arith.constant 0 : index
    %c0_4 = arith.constant 0 : index
    %5 = vector.load %arg3[%c0_3, %c0_4] : memref<128x128xf32, #tpu.memory_space<vmem>>, vector<128x128xf32>
    %cst = arith.constant dense<0.000000e+00> : vector<64x128xf32>
    %6 = tpu.matmul %4, %5, %cst {dimension_numbers = #tpu.dot_dimension_numbers<[1], [0], [0], [1], [0, 0, 1, 1], [], []>} : vector<64x128xf32>, vector<128x128xf32>, vector<64x128xf32> -> vector<64x128xf32>
    %c0_5 = arith.constant 0 : index
    %c0_6 = arith.constant 0 : index
    %7 = vector.load %arg4[%c0_5, %c0_6] : memref<1x128xf32, #tpu.memory_space<vmem>>, vector<1x128xf32>
    %8 = vector.broadcast %7 : vector<1x128xf32> to vector<64x128xf32>
    %9 = arith.addf %6, %8 : vector<64x128xf32>
    %10 = vector.shape_cast %9 : vector<64x128xf32> to vector<8x8x128xf32>
    %c0_7 = arith.constant 0 : index
    %c0_8 = arith.constant 0 : index
    %c0_9 = arith.constant 0 : index
    %11 = vector.load %arg7[%c0_7, %c0_8, %c0_9] : memref<8x8x128xf32, #tpu.memory_space<vmem>>, vector<8x8x128xf32>
    tpu.vector_store %arg7[%c0_7, %c0_8, %c0_9], %10 {strides = array<i32>} : memref<8x8x128xf32, #tpu.memory_space<vmem>>, vector<8x8x128xf32>,
    %c0_10 = arith.constant 0 : index
    %c0_11 = arith.constant 0 : index
    %12 = vector.load %arg8[%c0_10, %c0_11] : memref<8x128xf32, #tpu.memory_space<vmem>>, vector<8x128xf32>
    %c0_12 = arith.constant 0 : index
    %c0_13 = arith.constant 0 : index
    %c0_14 = arith.constant 0 : index
    %13 = vector.load %arg7[%c0_12, %c0_13, %c0_14] : memref<8x8x128xf32, #tpu.memory_space<vmem>>, vector<1x8x128xf32>
    %14 = vector.shape_cast %13 : vector<1x8x128xf32> to vector<8x128xf32>
    %c0_15 = arith.constant 0 : index
    %c0_16 = arith.constant 0 : index
    %15 = vector.load %arg5[%c0_15, %c0_16] : memref<128x128xf32, #tpu.memory_space<vmem>>, vector<128x128xf32>
    %cst_17 = arith.constant dense<0.000000e+00> : vector<8x128xf32>
    %16 = tpu.matmul %12, %15, %cst_17 {dimension_numbers = #tpu.dot_dimension_numbers<[1], [0], [0], [1], [0, 0, 1, 1], [], []>} : vector<8x128xf32>, vector<128x128xf32>, vector<8x128xf32> -> vector<8x128xf32>
    %17 = arith.addf %14, %16 : vector<8x128xf32>
    %18 = math.tanh %17 : vector<8x128xf32>
    %c0_18 = arith.constant 0 : index
    %c0_19 = arith.constant 0 : index
    %c0_20 = arith.constant 0 : index
    %19 = vector.load %arg7[%c0_18, %c0_19, %c0_20] : memref<8x8x128xf32, #tpu.memory_space<vmem>>, vector<1x8x128xf32>
    %20 = vector.shape_cast %19 : vector<1x8x128xf32> to vector<8x128xf32>
    %21 = vector.shape_cast %18 : vector<8x128xf32> to vector<1x8x128xf32>
    tpu.vector_store %arg7[%c0_18, %c0_19, %c0_20], %21 {strides = array<i32>} : memref<8x8x128xf32, #tpu.memory_space<vmem>>, vector<1x8x128xf32>,
    %c1 = arith.constant 1 : index
    %c0_21 = arith.constant 0 : index
    %c0_22 = arith.constant 0 : index
    %22 = vector.load %arg7[%c1, %c0_21, %c0_22] : memref<8x8x128xf32, #tpu.memory_space<vmem>>, vector<1x8x128xf32>
    %23 = vector.shape_cast %22 : vector<1x8x128xf32> to vector<8x128xf32>
    %c0_23 = arith.constant 0 : index
    %c0_24 = arith.constant 0 : index
    %24 = vector.load %arg5[%c0_23, %c0_24] : memref<128x128xf32, #tpu.memory_space<vmem>>, vector<128x128xf32>
    %cst_25 = arith.constant dense<0.000000e+00> : vector<8x128xf32>
    %25 = tpu.matmul %18, %24, %cst_25 {dimension_numbers = #tpu.dot_dimension_numbers<[1], [0], [0], [1], [0, 0, 1, 1], [], []>} : vector<8x128xf32>, vector<128x128xf32>, vector<8x128xf32> -> vector<8x128xf32>
    %26 = arith.addf %23, %25 : vector<8x128xf32>
    %27 = math.tanh %26 : vector<8x128xf32>
    %c1_26 = arith.constant 1 : index
    %c0_27 = arith.constant 0 : index
    %c0_28 = arith.constant 0 : index
    %28 = vector.load %arg7[%c1_26, %c0_27, %c0_28] : memref<8x8x128xf32, #tpu.memory_space<vmem>>, vector<1x8x128xf32>
    %29 = vector.shape_cast %28 : vector<1x8x128xf32> to vector<8x128xf32>
    %30 = vector.shape_cast %27 : vector<8x128xf32> to vector<1x8x128xf32>
    tpu.vector_store %arg7[%c1_26, %c0_27, %c0_28], %30 {strides = array<i32>} : memref<8x8x128xf32, #tpu.memory_space<vmem>>, vector<1x8x128xf32>,
    %c2 = arith.constant 2 : index
    %c0_29 = arith.constant 0 : index
    %c0_30 = arith.constant 0 : index
    %31 = vector.load %arg7[%c2, %c0_29, %c0_30] : memref<8x8x128xf32, #tpu.memory_space<vmem>>, vector<1x8x128xf32>
    %32 = vector.shape_cast %31 : vector<1x8x128xf32> to vector<8x128xf32>
    %c0_31 = arith.constant 0 : index
    %c0_32 = arith.constant 0 : index
    %33 = vector.load %arg5[%c0_31, %c0_32] : memref<128x128xf32, #tpu.memory_space<vmem>>, vector<128x128xf32>
    %cst_33 = arith.constant dense<0.000000e+00> : vector<8x128xf32>
    %34 = tpu.matmul %27, %33, %cst_33 {dimension_numbers = #tpu.dot_dimension_numbers<[1], [0], [0], [1], [0, 0, 1, 1], [], []>} : vector<8x128xf32>, vector<128x128xf32>, vector<8x128xf32> -> vector<8x128xf32>
    %35 = arith.addf %32, %34 : vector<8x128xf32>
    %36 = math.tanh %35 : vector<8x128xf32>
    %c2_34 = arith.constant 2 : index
    %c0_35 = arith.constant 0 : index
    %c0_36 = arith.constant 0 : index
    %37 = vector.load %arg7[%c2_34, %c0_35, %c0_36] : memref<8x8x128xf32, #tpu.memory_space<vmem>>, vector<1x8x128xf32>
    %38 = vector.shape_cast %37 : vector<1x8x128xf32> to vector<8x128xf32>
    %39 = vector.shape_cast %36 : vector<8x128xf32> to vector<1x8x128xf32>
    tpu.vector_store %arg7[%c2_34, %c0_35, %c0_36], %39 {strides = array<i32>} : memref<8x8x128xf32, #tpu.memory_space<vmem>>, vector<1x8x128xf32>,
    %c3 = arith.constant 3 : index
    %c0_37 = arith.constant 0 : index
    %c0_38 = arith.constant 0 : index
    %40 = vector.load %arg7[%c3, %c0_37, %c0_38] : memref<8x8x128xf32, #tpu.memory_space<vmem>>, vector<1x8x128xf32>
    %41 = vector.shape_cast %40 : vector<1x8x128xf32> to vector<8x128xf32>
    %c0_39 = arith.constant 0 : index
    %c0_40 = arith.constant 0 : index
    %42 = vector.load %arg5[%c0_39, %c0_40] : memref<128x128xf32, #tpu.memory_space<vmem>>, vector<128x128xf32>
    %cst_41 = arith.constant dense<0.000000e+00> : vector<8x128xf32>
    %43 = tpu.matmul %36, %42, %cst_41 {dimension_numbers = #tpu.dot_dimension_numbers<[1], [0], [0], [1], [0, 0, 1, 1], [], []>} : vector<8x128xf32>, vector<128x128xf32>, vector<8x128xf32> -> vector<8x128xf32>
    %44 = arith.addf %41, %43 : vector<8x128xf32>
    %45 = math.tanh %44 : vector<8x128xf32>
    %c3_42 = arith.constant 3 : index
    %c0_43 = arith.constant 0 : index
    %c0_44 = arith.constant 0 : index
    %46 = vector.load %arg7[%c3_42, %c0_43, %c0_44] : memref<8x8x128xf32, #tpu.memory_space<vmem>>, vector<1x8x128xf32>
    %47 = vector.shape_cast %46 : vector<1x8x128xf32> to vector<8x128xf32>
    %48 = vector.shape_cast %45 : vector<8x128xf32> to vector<1x8x128xf32>
    tpu.vector_store %arg7[%c3_42, %c0_43, %c0_44], %48 {strides = array<i32>} : memref<8x8x128xf32, #tpu.memory_space<vmem>>, vector<1x8x128xf32>,
    %c4 = arith.constant 4 : index
    %c0_45 = arith.constant 0 : index
    %c0_46 = arith.constant 0 : index
    %49 = vector.load %arg7[%c4, %c0_45, %c0_46] : memref<8x8x128xf32, #tpu.memory_space<vmem>>, vector<1x8x128xf32>
    %50 = vector.shape_cast %49 : vector<1x8x128xf32> to vector<8x128xf32>
    %c0_47 = arith.constant 0 : index
    %c0_48 = arith.constant 0 : index
    %51 = vector.load %arg5[%c0_47, %c0_48] : memref<128x128xf32, #tpu.memory_space<vmem>>, vector<128x128xf32>
    %cst_49 = arith.constant dense<0.000000e+00> : vector<8x128xf32>
    %52 = tpu.matmul %45, %51, %cst_49 {dimension_numbers = #tpu.dot_dimension_numbers<[1], [0], [0], [1], [0, 0, 1, 1], [], []>} : vector<8x128xf32>, vector<128x128xf32>, vector<8x128xf32> -> vector<8x128xf32>
    %53 = arith.addf %50, %52 : vector<8x128xf32>
    %54 = math.tanh %53 : vector<8x128xf32>
    %c4_50 = arith.constant 4 : index
    %c0_51 = arith.constant 0 : index
    %c0_52 = arith.constant 0 : index
    %55 = vector.load %arg7[%c4_50, %c0_51, %c0_52] : memref<8x8x128xf32, #tpu.memory_space<vmem>>, vector<1x8x128xf32>
    %56 = vector.shape_cast %55 : vector<1x8x128xf32> to vector<8x128xf32>
    %57 = vector.shape_cast %54 : vector<8x128xf32> to vector<1x8x128xf32>
    tpu.vector_store %arg7[%c4_50, %c0_51, %c0_52], %57 {strides = array<i32>} : memref<8x8x128xf32, #tpu.memory_space<vmem>>, vector<1x8x128xf32>,
    %c5 = arith.constant 5 : index
    %c0_53 = arith.constant 0 : index
    %c0_54 = arith.constant 0 : index
    %58 = vector.load %arg7[%c5, %c0_53, %c0_54] : memref<8x8x128xf32, #tpu.memory_space<vmem>>, vector<1x8x128xf32>
    %59 = vector.shape_cast %58 : vector<1x8x128xf32> to vector<8x128xf32>
    %c0_55 = arith.constant 0 : index
    %c0_56 = arith.constant 0 : index
    %60 = vector.load %arg5[%c0_55, %c0_56] : memref<128x128xf32, #tpu.memory_space<vmem>>, vector<128x128xf32>
    %cst_57 = arith.constant dense<0.000000e+00> : vector<8x128xf32>
    %61 = tpu.matmul %54, %60, %cst_57 {dimension_numbers = #tpu.dot_dimension_numbers<[1], [0], [0], [1], [0, 0, 1, 1], [], []>} : vector<8x128xf32>, vector<128x128xf32>, vector<8x128xf32> -> vector<8x128xf32>
    %62 = arith.addf %59, %61 : vector<8x128xf32>
    %63 = math.tanh %62 : vector<8x128xf32>
    %c5_58 = arith.constant 5 : index
    %c0_59 = arith.constant 0 : index
    %c0_60 = arith.constant 0 : index
    %64 = vector.load %arg7[%c5_58, %c0_59, %c0_60] : memref<8x8x128xf32, #tpu.memory_space<vmem>>, vector<1x8x128xf32>
    %65 = vector.shape_cast %64 : vector<1x8x128xf32> to vector<8x128xf32>
    %66 = vector.shape_cast %63 : vector<8x128xf32> to vector<1x8x128xf32>
    tpu.vector_store %arg7[%c5_58, %c0_59, %c0_60], %66 {strides = array<i32>} : memref<8x8x128xf32, #tpu.memory_space<vmem>>, vector<1x8x128xf32>,
    %c6 = arith.constant 6 : index
    %c0_61 = arith.constant 0 : index
    %c0_62 = arith.constant 0 : index
    %67 = vector.load %arg7[%c6, %c0_61, %c0_62] : memref<8x8x128xf32, #tpu.memory_space<vmem>>, vector<1x8x128xf32>
    %68 = vector.shape_cast %67 : vector<1x8x128xf32> to vector<8x128xf32>
    %c0_63 = arith.constant 0 : index
    %c0_64 = arith.constant 0 : index
    %69 = vector.load %arg5[%c0_63, %c0_64] : memref<128x128xf32, #tpu.memory_space<vmem>>, vector<128x128xf32>
    %cst_65 = arith.constant dense<0.000000e+00> : vector<8x128xf32>
    %70 = tpu.matmul %63, %69, %cst_65 {dimension_numbers = #tpu.dot_dimension_numbers<[1], [0], [0], [1], [0, 0, 1, 1], [], []>} : vector<8x128xf32>, vector<128x128xf32>, vector<8x128xf32> -> vector<8x128xf32>
    %71 = arith.addf %68, %70 : vector<8x128xf32>
    %72 = math.tanh %71 : vector<8x128xf32>
    %c6_66 = arith.constant 6 : index
    %c0_67 = arith.constant 0 : index
    %c0_68 = arith.constant 0 : index
    %73 = vector.load %arg7[%c6_66, %c0_67, %c0_68] : memref<8x8x128xf32, #tpu.memory_space<vmem>>, vector<1x8x128xf32>
    %74 = vector.shape_cast %73 : vector<1x8x128xf32> to vector<8x128xf32>
    %75 = vector.shape_cast %72 : vector<8x128xf32> to vector<1x8x128xf32>
    tpu.vector_store %arg7[%c6_66, %c0_67, %c0_68], %75 {strides = array<i32>} : memref<8x8x128xf32, #tpu.memory_space<vmem>>, vector<1x8x128xf32>,
    %c7 = arith.constant 7 : index
    %c0_69 = arith.constant 0 : index
    %c0_70 = arith.constant 0 : index
    %76 = vector.load %arg7[%c7, %c0_69, %c0_70] : memref<8x8x128xf32, #tpu.memory_space<vmem>>, vector<1x8x128xf32>
    %77 = vector.shape_cast %76 : vector<1x8x128xf32> to vector<8x128xf32>
    %c0_71 = arith.constant 0 : index
    %c0_72 = arith.constant 0 : index
    %78 = vector.load %arg5[%c0_71, %c0_72] : memref<128x128xf32, #tpu.memory_space<vmem>>, vector<128x128xf32>
    %cst_73 = arith.constant dense<0.000000e+00> : vector<8x128xf32>
    %79 = tpu.matmul %72, %78, %cst_73 {dimension_numbers = #tpu.dot_dimension_numbers<[1], [0], [0], [1], [0, 0, 1, 1], [], []>} : vector<8x128xf32>, vector<128x128xf32>, vector<8x128xf32> -> vector<8x128xf32>
    %80 = arith.addf %77, %79 : vector<8x128xf32>
    %81 = math.tanh %80 : vector<8x128xf32>
    %c7_74 = arith.constant 7 : index
    %c0_75 = arith.constant 0 : index
    %c0_76 = arith.constant 0 : index
    %82 = vector.load %arg7[%c7_74, %c0_75, %c0_76] : memref<8x8x128xf32, #tpu.memory_space<vmem>>, vector<1x8x128xf32>
    %83 = vector.shape_cast %82 : vector<1x8x128xf32> to vector<8x128xf32>
    %84 = vector.shape_cast %81 : vector<8x128xf32> to vector<1x8x128xf32>
    tpu.vector_store %arg7[%c7_74, %c0_75, %c0_76], %84 {strides = array<i32>} : memref<8x8x128xf32, #tpu.memory_space<vmem>>, vector<1x8x128xf32>,
    %c0_77 = arith.constant 0 : index
    %c0_78 = arith.constant 0 : index
    %85 = vector.load %arg8[%c0_77, %c0_78] : memref<8x128xf32, #tpu.memory_space<vmem>>, vector<8x128xf32>
    tpu.vector_store %arg8[%c0_77, %c0_78], %81 {strides = array<i32>} : memref<8x128xf32, #tpu.memory_space<vmem>>, vector<8x128xf32>,
    return
  }
  func.func @transform_0(%arg0: i32, %arg1: i32) -> (i32, i32, i32) {
    %c0_i32 = arith.constant 0 : i32
    %c0_i32_0 = arith.constant 0 : i32
    return %arg1, %arg0, %c0_i32 : i32, i32, i32
  }
  func.func @transform_1(%arg0: i32, %arg1: i32) -> (i32, i32) {
    %c0_i32 = arith.constant 0 : i32
    %c0_i32_0 = arith.constant 0 : i32
    %c0_i32_1 = arith.constant 0 : i32
    return %c0_i32, %c0_i32_0 : i32, i32
  }
  func.func @transform_2(%arg0: i32, %arg1: i32) -> (i32, i32) {
    %c0_i32 = arith.constant 0 : i32
    %c0_i32_0 = arith.constant 0 : i32
    %c0_i32_1 = arith.constant 0 : i32
    return %c0_i32, %c0_i32_0 : i32, i32
  }
  func.func @transform_3(%arg0: i32, %arg1: i32) -> (i32, i32) {
    %c0_i32 = arith.constant 0 : i32
    %c0_i32_0 = arith.constant 0 : i32
    %c0_i32_1 = arith.constant 0 : i32
    return %c0_i32, %c0_i32_0 : i32, i32
  }
  func.func @transform_4(%arg0: i32, %arg1: i32) -> (i32, i32) {
    %c0_i32 = arith.constant 0 : i32
    %c0_i32_0 = arith.constant 0 : i32
    return %arg0, %c0_i32 : i32, i32
  }
  func.func @transform_5(%arg0: i32, %arg1: i32) -> (i32, i32, i32) {
    %c0_i32 = arith.constant 0 : i32
    %c0_i32_0 = arith.constant 0 : i32
    return %arg1, %arg0, %c0_i32 : i32, i32, i32
  }
}

module attributes {stable_mosaic.version = 11 : i64} {
  func.func @_rnn_last_layer_fc_kernel(%arg0: i32, %arg1: i32, %arg2: memref<8x8x128xf32, #tpu.memory_space<vmem>>, %arg3: memref<128x128xf32, #tpu.memory_space<vmem>>, %arg4: memref<1x128xf32, #tpu.memory_space<vmem>>, %arg5: memref<128x128xf32, #tpu.memory_space<vmem>>, %arg6: memref<8x128xf32, #tpu.memory_space<vmem>>, %arg7: memref<128x128xf32, #tpu.memory_space<vmem>>, %arg8: memref<1x128xf32, #tpu.memory_space<vmem>>, %arg9: memref<8x8x128xf32, #tpu.memory_space<vmem>>, %arg10: memref<8x128xf32, #tpu.memory_space<vmem>>, %arg11: memref<8x8x128xf32, #tpu.memory_space<vmem>>) attributes {dimension_semantics = [#tpu.dimension_semantics<parallel>, #tpu.dimension_semantics<arbitrary>], iteration_bounds = array<i64: 1, 1>, scalar_prefetch = 0 : i64, scratch_operands = 2 : i64, tpu.core_type = #tpu.core_type<tc>, window_params = [{transform_indices = @transform_0, window_bounds = array<i64: 8, 8, 128>}, {pipeline_mode = #tpu.pipeline_mode<synchronous>, transform_indices = @transform_1, window_bounds = array<i64: 128, 128>}, {pipeline_mode = #tpu.pipeline_mode<synchronous>, transform_indices = @transform_2, window_bounds = array<i64: 1, 128>}, {pipeline_mode = #tpu.pipeline_mode<synchronous>, transform_indices = @transform_3, window_bounds = array<i64: 128, 128>}, {transform_indices = @transform_4, window_bounds = array<i64: 8, 128>}, {pipeline_mode = #tpu.pipeline_mode<synchronous>, transform_indices = @transform_5, window_bounds = array<i64: 128, 128>}, {pipeline_mode = #tpu.pipeline_mode<synchronous>, transform_indices = @transform_6, window_bounds = array<i64: 1, 128>}, {transform_indices = @transform_7, window_bounds = array<i64: 8, 8, 128>}]} {
    %c0_i32 = arith.constant 0 : i32
    %0 = arith.cmpi eq, %arg1, %c0_i32 : i32
    %1 = arith.extui %0 : i1 to i32
    %c0_i32_0 = arith.constant 0 : i32
    %2 = arith.cmpi ne, %1, %c0_i32_0 : i32
    scf.if %2 {
      %c0_90 = arith.constant 0 : index
      %c0_91 = arith.constant 0 : index
      %95 = vector.load %arg6[%c0_90, %c0_91] : memref<8x128xf32, #tpu.memory_space<vmem>>, vector<8x128xf32>
      %c0_92 = arith.constant 0 : index
      %c0_93 = arith.constant 0 : index
      %96 = vector.load %arg10[%c0_92, %c0_93] : memref<8x128xf32, #tpu.memory_space<vmem>>, vector<8x128xf32>
      tpu.vector_store %arg10[%c0_92, %c0_93], %95 {strides = array<i32>} : memref<8x128xf32, #tpu.memory_space<vmem>>, vector<8x128xf32>,
    } else {
    }
    %c0 = arith.constant 0 : index
    %c0_1 = arith.constant 0 : index
    %c0_2 = arith.constant 0 : index
    %3 = vector.load %arg2[%c0, %c0_1, %c0_2] : memref<8x8x128xf32, #tpu.memory_space<vmem>>, vector<8x8x128xf32>
    %4 = vector.shape_cast %3 : vector<8x8x128xf32> to vector<64x128xf32>
    %c0_3 = arith.constant 0 : index
    %c0_4 = arith.constant 0 : index
    %5 = vector.load %arg3[%c0_3, %c0_4] : memref<128x128xf32, #tpu.memory_space<vmem>>, vector<128x128xf32>
    %cst = arith.constant dense<0.000000e+00> : vector<64x128xf32>
    %6 = tpu.matmul %4, %5, %cst {dimension_numbers = #tpu.dot_dimension_numbers<[1], [0], [0], [1], [0, 0, 1, 1], [], []>} : vector<64x128xf32>, vector<128x128xf32>, vector<64x128xf32> -> vector<64x128xf32>
    %c0_5 = arith.constant 0 : index
    %c0_6 = arith.constant 0 : index
    %7 = vector.load %arg4[%c0_5, %c0_6] : memref<1x128xf32, #tpu.memory_space<vmem>>, vector<1x128xf32>
    %8 = vector.broadcast %7 : vector<1x128xf32> to vector<64x128xf32>
    %9 = arith.addf %6, %8 : vector<64x128xf32>
    %10 = vector.shape_cast %9 : vector<64x128xf32> to vector<8x8x128xf32>
    %c0_7 = arith.constant 0 : index
    %c0_8 = arith.constant 0 : index
    %c0_9 = arith.constant 0 : index
    %11 = vector.load %arg11[%c0_7, %c0_8, %c0_9] : memref<8x8x128xf32, #tpu.memory_space<vmem>>, vector<8x8x128xf32>
    tpu.vector_store %arg11[%c0_7, %c0_8, %c0_9], %10 {strides = array<i32>} : memref<8x8x128xf32, #tpu.memory_space<vmem>>, vector<8x8x128xf32>,
    %c0_10 = arith.constant 0 : index
    %c0_11 = arith.constant 0 : index
    %12 = vector.load %arg10[%c0_10, %c0_11] : memref<8x128xf32, #tpu.memory_space<vmem>>, vector<8x128xf32>
    %c0_12 = arith.constant 0 : index
    %c0_13 = arith.constant 0 : index
    %c0_14 = arith.constant 0 : index
    %13 = vector.load %arg11[%c0_12, %c0_13, %c0_14] : memref<8x8x128xf32, #tpu.memory_space<vmem>>, vector<1x8x128xf32>
    %14 = vector.shape_cast %13 : vector<1x8x128xf32> to vector<8x128xf32>
    %c0_15 = arith.constant 0 : index
    %c0_16 = arith.constant 0 : index
    %15 = vector.load %arg5[%c0_15, %c0_16] : memref<128x128xf32, #tpu.memory_space<vmem>>, vector<128x128xf32>
    %cst_17 = arith.constant dense<0.000000e+00> : vector<8x128xf32>
    %16 = tpu.matmul %12, %15, %cst_17 {dimension_numbers = #tpu.dot_dimension_numbers<[1], [0], [0], [1], [0, 0, 1, 1], [], []>} : vector<8x128xf32>, vector<128x128xf32>, vector<8x128xf32> -> vector<8x128xf32>
    %17 = arith.addf %14, %16 : vector<8x128xf32>
    %18 = math.tanh %17 : vector<8x128xf32>
    %c0_18 = arith.constant 0 : index
    %c0_19 = arith.constant 0 : index
    %c0_20 = arith.constant 0 : index
    %19 = vector.load %arg11[%c0_18, %c0_19, %c0_20] : memref<8x8x128xf32, #tpu.memory_space<vmem>>, vector<1x8x128xf32>
    %20 = vector.shape_cast %19 : vector<1x8x128xf32> to vector<8x128xf32>
    %21 = vector.shape_cast %18 : vector<8x128xf32> to vector<1x8x128xf32>
    tpu.vector_store %arg11[%c0_18, %c0_19, %c0_20], %21 {strides = array<i32>} : memref<8x8x128xf32, #tpu.memory_space<vmem>>, vector<1x8x128xf32>,
    %c1 = arith.constant 1 : index
    %c0_21 = arith.constant 0 : index
    %c0_22 = arith.constant 0 : index
    %22 = vector.load %arg11[%c1, %c0_21, %c0_22] : memref<8x8x128xf32, #tpu.memory_space<vmem>>, vector<1x8x128xf32>
    %23 = vector.shape_cast %22 : vector<1x8x128xf32> to vector<8x128xf32>
    %c0_23 = arith.constant 0 : index
    %c0_24 = arith.constant 0 : index
    %24 = vector.load %arg5[%c0_23, %c0_24] : memref<128x128xf32, #tpu.memory_space<vmem>>, vector<128x128xf32>
    %cst_25 = arith.constant dense<0.000000e+00> : vector<8x128xf32>
    %25 = tpu.matmul %18, %24, %cst_25 {dimension_numbers = #tpu.dot_dimension_numbers<[1], [0], [0], [1], [0, 0, 1, 1], [], []>} : vector<8x128xf32>, vector<128x128xf32>, vector<8x128xf32> -> vector<8x128xf32>
    %26 = arith.addf %23, %25 : vector<8x128xf32>
    %27 = math.tanh %26 : vector<8x128xf32>
    %c1_26 = arith.constant 1 : index
    %c0_27 = arith.constant 0 : index
    %c0_28 = arith.constant 0 : index
    %28 = vector.load %arg11[%c1_26, %c0_27, %c0_28] : memref<8x8x128xf32, #tpu.memory_space<vmem>>, vector<1x8x128xf32>
    %29 = vector.shape_cast %28 : vector<1x8x128xf32> to vector<8x128xf32>
    %30 = vector.shape_cast %27 : vector<8x128xf32> to vector<1x8x128xf32>
    tpu.vector_store %arg11[%c1_26, %c0_27, %c0_28], %30 {strides = array<i32>} : memref<8x8x128xf32, #tpu.memory_space<vmem>>, vector<1x8x128xf32>,
    %c2 = arith.constant 2 : index
    %c0_29 = arith.constant 0 : index
    %c0_30 = arith.constant 0 : index
    %31 = vector.load %arg11[%c2, %c0_29, %c0_30] : memref<8x8x128xf32, #tpu.memory_space<vmem>>, vector<1x8x128xf32>
    %32 = vector.shape_cast %31 : vector<1x8x128xf32> to vector<8x128xf32>
    %c0_31 = arith.constant 0 : index
    %c0_32 = arith.constant 0 : index
    %33 = vector.load %arg5[%c0_31, %c0_32] : memref<128x128xf32, #tpu.memory_space<vmem>>, vector<128x128xf32>
    %cst_33 = arith.constant dense<0.000000e+00> : vector<8x128xf32>
    %34 = tpu.matmul %27, %33, %cst_33 {dimension_numbers = #tpu.dot_dimension_numbers<[1], [0], [0], [1], [0, 0, 1, 1], [], []>} : vector<8x128xf32>, vector<128x128xf32>, vector<8x128xf32> -> vector<8x128xf32>
    %35 = arith.addf %32, %34 : vector<8x128xf32>
    %36 = math.tanh %35 : vector<8x128xf32>
    %c2_34 = arith.constant 2 : index
    %c0_35 = arith.constant 0 : index
    %c0_36 = arith.constant 0 : index
    %37 = vector.load %arg11[%c2_34, %c0_35, %c0_36] : memref<8x8x128xf32, #tpu.memory_space<vmem>>, vector<1x8x128xf32>
    %38 = vector.shape_cast %37 : vector<1x8x128xf32> to vector<8x128xf32>
    %39 = vector.shape_cast %36 : vector<8x128xf32> to vector<1x8x128xf32>
    tpu.vector_store %arg11[%c2_34, %c0_35, %c0_36], %39 {strides = array<i32>} : memref<8x8x128xf32, #tpu.memory_space<vmem>>, vector<1x8x128xf32>,
    %c3 = arith.constant 3 : index
    %c0_37 = arith.constant 0 : index
    %c0_38 = arith.constant 0 : index
    %40 = vector.load %arg11[%c3, %c0_37, %c0_38] : memref<8x8x128xf32, #tpu.memory_space<vmem>>, vector<1x8x128xf32>
    %41 = vector.shape_cast %40 : vector<1x8x128xf32> to vector<8x128xf32>
    %c0_39 = arith.constant 0 : index
    %c0_40 = arith.constant 0 : index
    %42 = vector.load %arg5[%c0_39, %c0_40] : memref<128x128xf32, #tpu.memory_space<vmem>>, vector<128x128xf32>
    %cst_41 = arith.constant dense<0.000000e+00> : vector<8x128xf32>
    %43 = tpu.matmul %36, %42, %cst_41 {dimension_numbers = #tpu.dot_dimension_numbers<[1], [0], [0], [1], [0, 0, 1, 1], [], []>} : vector<8x128xf32>, vector<128x128xf32>, vector<8x128xf32> -> vector<8x128xf32>
    %44 = arith.addf %41, %43 : vector<8x128xf32>
    %45 = math.tanh %44 : vector<8x128xf32>
    %c3_42 = arith.constant 3 : index
    %c0_43 = arith.constant 0 : index
    %c0_44 = arith.constant 0 : index
    %46 = vector.load %arg11[%c3_42, %c0_43, %c0_44] : memref<8x8x128xf32, #tpu.memory_space<vmem>>, vector<1x8x128xf32>
    %47 = vector.shape_cast %46 : vector<1x8x128xf32> to vector<8x128xf32>
    %48 = vector.shape_cast %45 : vector<8x128xf32> to vector<1x8x128xf32>
    tpu.vector_store %arg11[%c3_42, %c0_43, %c0_44], %48 {strides = array<i32>} : memref<8x8x128xf32, #tpu.memory_space<vmem>>, vector<1x8x128xf32>,
    %c4 = arith.constant 4 : index
    %c0_45 = arith.constant 0 : index
    %c0_46 = arith.constant 0 : index
    %49 = vector.load %arg11[%c4, %c0_45, %c0_46] : memref<8x8x128xf32, #tpu.memory_space<vmem>>, vector<1x8x128xf32>
    %50 = vector.shape_cast %49 : vector<1x8x128xf32> to vector<8x128xf32>
    %c0_47 = arith.constant 0 : index
    %c0_48 = arith.constant 0 : index
    %51 = vector.load %arg5[%c0_47, %c0_48] : memref<128x128xf32, #tpu.memory_space<vmem>>, vector<128x128xf32>
    %cst_49 = arith.constant dense<0.000000e+00> : vector<8x128xf32>
    %52 = tpu.matmul %45, %51, %cst_49 {dimension_numbers = #tpu.dot_dimension_numbers<[1], [0], [0], [1], [0, 0, 1, 1], [], []>} : vector<8x128xf32>, vector<128x128xf32>, vector<8x128xf32> -> vector<8x128xf32>
    %53 = arith.addf %50, %52 : vector<8x128xf32>
    %54 = math.tanh %53 : vector<8x128xf32>
    %c4_50 = arith.constant 4 : index
    %c0_51 = arith.constant 0 : index
    %c0_52 = arith.constant 0 : index
    %55 = vector.load %arg11[%c4_50, %c0_51, %c0_52] : memref<8x8x128xf32, #tpu.memory_space<vmem>>, vector<1x8x128xf32>
    %56 = vector.shape_cast %55 : vector<1x8x128xf32> to vector<8x128xf32>
    %57 = vector.shape_cast %54 : vector<8x128xf32> to vector<1x8x128xf32>
    tpu.vector_store %arg11[%c4_50, %c0_51, %c0_52], %57 {strides = array<i32>} : memref<8x8x128xf32, #tpu.memory_space<vmem>>, vector<1x8x128xf32>,
    %c5 = arith.constant 5 : index
    %c0_53 = arith.constant 0 : index
    %c0_54 = arith.constant 0 : index
    %58 = vector.load %arg11[%c5, %c0_53, %c0_54] : memref<8x8x128xf32, #tpu.memory_space<vmem>>, vector<1x8x128xf32>
    %59 = vector.shape_cast %58 : vector<1x8x128xf32> to vector<8x128xf32>
    %c0_55 = arith.constant 0 : index
    %c0_56 = arith.constant 0 : index
    %60 = vector.load %arg5[%c0_55, %c0_56] : memref<128x128xf32, #tpu.memory_space<vmem>>, vector<128x128xf32>
    %cst_57 = arith.constant dense<0.000000e+00> : vector<8x128xf32>
    %61 = tpu.matmul %54, %60, %cst_57 {dimension_numbers = #tpu.dot_dimension_numbers<[1], [0], [0], [1], [0, 0, 1, 1], [], []>} : vector<8x128xf32>, vector<128x128xf32>, vector<8x128xf32> -> vector<8x128xf32>
    %62 = arith.addf %59, %61 : vector<8x128xf32>
    %63 = math.tanh %62 : vector<8x128xf32>
    %c5_58 = arith.constant 5 : index
    %c0_59 = arith.constant 0 : index
    %c0_60 = arith.constant 0 : index
    %64 = vector.load %arg11[%c5_58, %c0_59, %c0_60] : memref<8x8x128xf32, #tpu.memory_space<vmem>>, vector<1x8x128xf32>
    %65 = vector.shape_cast %64 : vector<1x8x128xf32> to vector<8x128xf32>
    %66 = vector.shape_cast %63 : vector<8x128xf32> to vector<1x8x128xf32>
    tpu.vector_store %arg11[%c5_58, %c0_59, %c0_60], %66 {strides = array<i32>} : memref<8x8x128xf32, #tpu.memory_space<vmem>>, vector<1x8x128xf32>,
    %c6 = arith.constant 6 : index
    %c0_61 = arith.constant 0 : index
    %c0_62 = arith.constant 0 : index
    %67 = vector.load %arg11[%c6, %c0_61, %c0_62] : memref<8x8x128xf32, #tpu.memory_space<vmem>>, vector<1x8x128xf32>
    %68 = vector.shape_cast %67 : vector<1x8x128xf32> to vector<8x128xf32>
    %c0_63 = arith.constant 0 : index
    %c0_64 = arith.constant 0 : index
    %69 = vector.load %arg5[%c0_63, %c0_64] : memref<128x128xf32, #tpu.memory_space<vmem>>, vector<128x128xf32>
    %cst_65 = arith.constant dense<0.000000e+00> : vector<8x128xf32>
    %70 = tpu.matmul %63, %69, %cst_65 {dimension_numbers = #tpu.dot_dimension_numbers<[1], [0], [0], [1], [0, 0, 1, 1], [], []>} : vector<8x128xf32>, vector<128x128xf32>, vector<8x128xf32> -> vector<8x128xf32>
    %71 = arith.addf %68, %70 : vector<8x128xf32>
    %72 = math.tanh %71 : vector<8x128xf32>
    %c6_66 = arith.constant 6 : index
    %c0_67 = arith.constant 0 : index
    %c0_68 = arith.constant 0 : index
    %73 = vector.load %arg11[%c6_66, %c0_67, %c0_68] : memref<8x8x128xf32, #tpu.memory_space<vmem>>, vector<1x8x128xf32>
    %74 = vector.shape_cast %73 : vector<1x8x128xf32> to vector<8x128xf32>
    %75 = vector.shape_cast %72 : vector<8x128xf32> to vector<1x8x128xf32>
    tpu.vector_store %arg11[%c6_66, %c0_67, %c0_68], %75 {strides = array<i32>} : memref<8x8x128xf32, #tpu.memory_space<vmem>>, vector<1x8x128xf32>,
    %c7 = arith.constant 7 : index
    %c0_69 = arith.constant 0 : index
    %c0_70 = arith.constant 0 : index
    %76 = vector.load %arg11[%c7, %c0_69, %c0_70] : memref<8x8x128xf32, #tpu.memory_space<vmem>>, vector<1x8x128xf32>
    %77 = vector.shape_cast %76 : vector<1x8x128xf32> to vector<8x128xf32>
    %c0_71 = arith.constant 0 : index
    %c0_72 = arith.constant 0 : index
    %78 = vector.load %arg5[%c0_71, %c0_72] : memref<128x128xf32, #tpu.memory_space<vmem>>, vector<128x128xf32>
    %cst_73 = arith.constant dense<0.000000e+00> : vector<8x128xf32>
    %79 = tpu.matmul %72, %78, %cst_73 {dimension_numbers = #tpu.dot_dimension_numbers<[1], [0], [0], [1], [0, 0, 1, 1], [], []>} : vector<8x128xf32>, vector<128x128xf32>, vector<8x128xf32> -> vector<8x128xf32>
    %80 = arith.addf %77, %79 : vector<8x128xf32>
    %81 = math.tanh %80 : vector<8x128xf32>
    %c7_74 = arith.constant 7 : index
    %c0_75 = arith.constant 0 : index
    %c0_76 = arith.constant 0 : index
    %82 = vector.load %arg11[%c7_74, %c0_75, %c0_76] : memref<8x8x128xf32, #tpu.memory_space<vmem>>, vector<1x8x128xf32>
    %83 = vector.shape_cast %82 : vector<1x8x128xf32> to vector<8x128xf32>
    %84 = vector.shape_cast %81 : vector<8x128xf32> to vector<1x8x128xf32>
    tpu.vector_store %arg11[%c7_74, %c0_75, %c0_76], %84 {strides = array<i32>} : memref<8x8x128xf32, #tpu.memory_space<vmem>>, vector<1x8x128xf32>,
    %c0_77 = arith.constant 0 : index
    %c0_78 = arith.constant 0 : index
    %85 = vector.load %arg10[%c0_77, %c0_78] : memref<8x128xf32, #tpu.memory_space<vmem>>, vector<8x128xf32>
    tpu.vector_store %arg10[%c0_77, %c0_78], %81 {strides = array<i32>} : memref<8x128xf32, #tpu.memory_space<vmem>>, vector<8x128xf32>,
    %c0_79 = arith.constant 0 : index
    %c0_80 = arith.constant 0 : index
    %c0_81 = arith.constant 0 : index
    %86 = vector.load %arg11[%c0_79, %c0_80, %c0_81] : memref<8x8x128xf32, #tpu.memory_space<vmem>>, vector<8x8x128xf32>
    %87 = vector.shape_cast %86 : vector<8x8x128xf32> to vector<64x128xf32>
    %c0_82 = arith.constant 0 : index
    %c0_83 = arith.constant 0 : index
    %88 = vector.load %arg7[%c0_82, %c0_83] : memref<128x128xf32, #tpu.memory_space<vmem>>, vector<128x128xf32>
    %cst_84 = arith.constant dense<0.000000e+00> : vector<64x128xf32>
    %89 = tpu.matmul %87, %88, %cst_84 {dimension_numbers = #tpu.dot_dimension_numbers<[1], [0], [0], [1], [0, 0, 1, 1], [], []>} : vector<64x128xf32>, vector<128x128xf32>, vector<64x128xf32> -> vector<64x128xf32>
    %c0_85 = arith.constant 0 : index
    %c0_86 = arith.constant 0 : index
    %90 = vector.load %arg8[%c0_85, %c0_86] : memref<1x128xf32, #tpu.memory_space<vmem>>, vector<1x128xf32>
    %91 = vector.broadcast %90 : vector<1x128xf32> to vector<64x128xf32>
    %92 = arith.addf %89, %91 : vector<64x128xf32>
    %93 = vector.shape_cast %92 : vector<64x128xf32> to vector<8x8x128xf32>
    %c0_87 = arith.constant 0 : index
    %c0_88 = arith.constant 0 : index
    %c0_89 = arith.constant 0 : index
    %94 = vector.load %arg9[%c0_87, %c0_88, %c0_89] : memref<8x8x128xf32, #tpu.memory_space<vmem>>, vector<8x8x128xf32>
    tpu.vector_store %arg9[%c0_87, %c0_88, %c0_89], %93 {strides = array<i32>} : memref<8x8x128xf32, #tpu.memory_space<vmem>>, vector<8x8x128xf32>,
    return
  }
  func.func @transform_0(%arg0: i32, %arg1: i32) -> (i32, i32, i32) {
    %c0_i32 = arith.constant 0 : i32
    %c0_i32_0 = arith.constant 0 : i32
    return %arg1, %arg0, %c0_i32 : i32, i32, i32
  }
  func.func @transform_1(%arg0: i32, %arg1: i32) -> (i32, i32) {
    %c0_i32 = arith.constant 0 : i32
    %c0_i32_0 = arith.constant 0 : i32
    %c0_i32_1 = arith.constant 0 : i32
    return %c0_i32, %c0_i32_0 : i32, i32
  }
  func.func @transform_2(%arg0: i32, %arg1: i32) -> (i32, i32) {
    %c0_i32 = arith.constant 0 : i32
    %c0_i32_0 = arith.constant 0 : i32
    %c0_i32_1 = arith.constant 0 : i32
    return %c0_i32, %c0_i32_0 : i32, i32
  }
  func.func @transform_3(%arg0: i32, %arg1: i32) -> (i32, i32) {
    %c0_i32 = arith.constant 0 : i32
    %c0_i32_0 = arith.constant 0 : i32
    %c0_i32_1 = arith.constant 0 : i32
    return %c0_i32, %c0_i32_0 : i32, i32
  }
  func.func @transform_4(%arg0: i32, %arg1: i32) -> (i32, i32) {
    %c0_i32 = arith.constant 0 : i32
    %c0_i32_0 = arith.constant 0 : i32
    return %arg0, %c0_i32 : i32, i32
  }
  func.func @transform_5(%arg0: i32, %arg1: i32) -> (i32, i32) {
    %c0_i32 = arith.constant 0 : i32
    %c0_i32_0 = arith.constant 0 : i32
    %c0_i32_1 = arith.constant 0 : i32
    return %c0_i32, %c0_i32_0 : i32, i32
  }
  func.func @transform_6(%arg0: i32, %arg1: i32) -> (i32, i32) {
    %c0_i32 = arith.constant 0 : i32
    %c0_i32_0 = arith.constant 0 : i32
    %c0_i32_1 = arith.constant 0 : i32
    return %c0_i32, %c0_i32_0 : i32, i32
  }
  func.func @transform_7(%arg0: i32, %arg1: i32) -> (i32, i32, i32) {
    %c0_i32 = arith.constant 0 : i32
    %c0_i32_0 = arith.constant 0 : i32
    return %arg1, %arg0, %c0_i32 : i32, i32, i32
  }
}

</mosaic_0001>

<bundles_post_ra>
// kernel: rnn_forward.2
= control target key start
LH: loop header
LB: loop body
LE: loop exit
PB: predicated region body
PF: predicated region fallthrough
CT: control target
= control target key end

     0   :  { %10 = vsyncpa [#allocation4], 0  ;;  %s1687_s18 = smov [#allocation3]   ;;  %s2019_s0 = inlined_call_operand.vmem [shape: f32[8,8,128], index: 0, kind: input, shape index: {}]   ;;  %s2020_s1 = inlined_call_operand.vmem [shape: f32[128,128], index: 1, kind: input, shape index: {}]   ;;  %s2021_s2 = inlined_call_operand.vmem [shape: f32[1,128], index: 2, kind: input, shape index: {}]   ;;  %s2022_s3 = inlined_call_operand.hbm [shape: f32[128,128], index: 3, kind: input, shape index: {}]   ;;  %s2023_s4 = inlined_call_operand.vmem [shape: f32[8,128], index: 4, kind: input, shape index: {}]   ;;  %s2024_s5 = inlined_call_operand.vmem [shape: f32[8,8,128], index: 5, kind: output, shape index: {}]  }
   0x1   :  { %s22_s19 = sshll.u32 %s1687_s18, 4  ;;  %s1663_s22 = scalar_lea.hbm %s2022_s3, 2048  ;;  %s23_s19 = int_to_ptr.vmem [resolvable:$true] %s22_s19 }
   0x2   :  { %p1664_p0 = scmp.ne.s32.totalorder %s2022_s3, %s1663_s22  ;;  %p1667_p1 = scmp.lt.u32.totalorder %s1663_s22, %s2022_s3 }
   0x4   :  { %p1669_p2 = pnand %p1667_p1, %p1664_p0 }
   0x6   :  { %1672 = shalt.err (!%p1669_p2)
}
   0x7   :  { %s1673_s27 = scalar_lea.vmem %s23_s19, 2048  ;;  %p1678_p4 = scmp.lt.s32.totalorder %s23_s19, %s23_s19 }
   0x8   :  { %p1674_p3 = scmp.ne.s32.totalorder %s23_s19, %s1673_s27  ;;  %p1679_p5 = scmp.lt.s32.totalorder %s1673_s27, %s1673_s27 }
   0xa   :  { %p1680_p6 = por %p1679_p5, %p1678_p4 }
   0xc   :  { %p1681_p7 = pnand %p1680_p6, %p1674_p3 }
   0xe   :  { %1684 = shalt.err (!%p1681_p7)
}
   0xf   :  { %s1688_s28 = smov 128   ;;  %s1689_s29 = smov 8  }
  0x10   :  { %28 = dma.hbm_to_vmem [thread:$0]  %s2022_s3, 2048, %s23_s19, [#allocation4], %s1688_s28, %s1688_s28, %s1689_s29  }
  0x11   :  { %1685 = dma.done.wait [#allocation4], 2048  }
  0x12   :  { %1686 = vsyncadd [#allocation4], 4294965248  ;;  %v1690_v0 = vmov 0.0|0.0   ;;  %vm1691_vm0 = vmmov 0   ;;  %v1692_v1 = vmov 0.0   ;;  %v48_v2 = vld [vmem:[%s2020_s1] sm:$0xff] }
  0x13   :  { %1449 = vmatprep.subr.bf16.mxu1 %v1690_v0  ;;  %1169 = vmatprep.mubr.msk.f32.mxu1 %vm1691_vm0, %v1692_v1  ;;  %v49_v3 = vld [vmem:[%s2020_s1 + $0x8] sm:$0xff]  ;;  %v50_v4 = vld [vmem:[%s2020_s1 + $0x10] sm:$0xff]  ;;  %v51_v6 = vld [vmem:[%s2020_s1 + $0x18] sm:$0xff] }
  0x14   :  { %v1417_v5 = vpack.c.bf16 %v49_v3, %v48_v2  ;;  %v52_v7 = vld [vmem:[%s2020_s1 + $0x20] sm:$0xff]  ;;  %v1421_v8 = vpack.c.bf16 %v51_v6, %v50_v4  ;;  %v53_v9 = vld [vmem:[%s2020_s1 + $0x28] sm:$0xff]  ;;  %v188_v13 = vld [vmem:[#allocation3 + $0x10] sm:$0xff] }
  0x15   :  { %v186_v10 = vld [vmem:[#allocation3] sm:$0xff]  ;;  %v187_v11 = vld [vmem:[#allocation3 + $0x8] sm:$0xff]  ;;  %v189_v14 = vld [vmem:[#allocation3 + $0x18] sm:$0xff]  ;;  %v1425_v15 = vpack.c.bf16 %v53_v9, %v52_v7 }
  0x16   :  { %1418 = vmatprep.subr.bf16.mxu0 %v1417_v5  ;;  %v1756_v12 = vpack.c.bf16 %v187_v11, %v186_v10  ;;  %v54_v16 = vld [vmem:[%s2020_s1 + $0x30] sm:$0xff]  ;;  %v1762_v17 = vpack.c.bf16 %v189_v14, %v188_v13  ;;  %v55_v18 = vld [vmem:[%s2020_s1 + $0x38] sm:$0xff]  ;;  %v190_v19 = vld [vmem:[#allocation3 + $0x20] sm:$0xff] }
  0x17   :  { %1420 = vmatpush3.bf16.msra.mxu0 %v1417_v5  ;;  %v191_v20 = vld [vmem:[#allocation3 + $0x28] sm:$0xff]  ;;  %v40_v21 = vld [vmem:[%s2019_s0] sm:$0xff]  ;;  %v1429_v22 = vpack.c.bf16 %v55_v18, %v54_v16  ;;  %v192_v26 = vld [vmem:[#allocation3 + $0x30] sm:$0xff] }
  0x18   :  { %1422 = vmatprep.subr.bf16.mxu0 %v1421_v8  ;;  %1451 = vmatpush3.bf16.msra.mxu1 %v1756_v12  ;;  %v56_v23 = vld [vmem:[%s2020_s1 + $0x40] sm:$0xff]  ;;  %v1775_v24 = vpack.c.bf16 %v191_v20, %v190_v19  ;;  %v57_v25 = vld [vmem:[%s2020_s1 + $0x48] sm:$0xff]  ;;  %v193_v27 = vld [vmem:[#allocation3 + $0x38] sm:$0xff] }
  0x19   :  { %1452 = vmatprep.subr.bf16.mxu1 %v1690_v0  ;;  %1125 = vmatprep.mubr.f32.mxu0 %v40_v21  ;;  %v1433_v28 = vpack.c.bf16 %v57_v25, %v56_v23  ;;  %v58_v29 = vld [vmem:[%s2020_s1 + $0x50] sm:$0xff]  ;;  %v1785_v30 = vpack.c.bf16 %v193_v27, %v192_v26  ;;  %v59_v31 = vld [vmem:[%s2020_s1 + $0x58] sm:$0xff]  ;;  %v194_v32 = vld [vmem:[#allocation3 + $0x40] sm:$0xff] }
  0x1a   :  { %v195_v33 = vld [vmem:[#allocation3 + $0x48] sm:$0xff]  ;;  %v1437_v34 = vpack.c.bf16 %v59_v31, %v58_v29  ;;  %v60_v35 = vld [vmem:[%s2020_s1 + $0x60] sm:$0xff]  ;;  %v196_v38 = vld [vmem:[#allocation3 + $0x50] sm:$0xff] }
  0x1b   :  { %1424 = vmatpush3.bf16.msra.mxu0 %v1421_v8  ;;  %v1795_v36 = vpack.c.bf16 %v195_v33, %v194_v32  ;;  %v61_v37 = vld [vmem:[%s2020_s1 + $0x68] sm:$0xff]  ;;  %v197_v39 = vld [vmem:[#allocation3 + $0x58] sm:$0xff]  ;;  %v62_v41 = vld [vmem:[%s2020_s1 + $0x70] sm:$0xff] }
  0x1c   :  { %1426 = vmatprep.subr.bf16.mxu0 %v1425_v15  ;;  %1454 = vmatpush3.bf16.msra.mxu1 %v1762_v17  ;;  %v1441_v40 = vpack.c.bf16 %v61_v37, %v60_v35  ;;  %v1805_v42 = vpack.c.bf16 %v197_v39, %v196_v38  ;;  %v63_v43 = vld [vmem:[%s2020_s1 + $0x78] sm:$0xff]  ;;  %v198_v44 = vld [vmem:[#allocation3 + $0x60] sm:$0xff]  ;;  %v199_v45 = vld [vmem:[#allocation3 + $0x68] sm:$0xff] }
  0x1d   :  { %1455 = vmatprep.subr.bf16.mxu1 %v1690_v0  ;;  %v1445_v46 = vpack.c.bf16 %v63_v43, %v62_v41  ;;  %v1812_v47 = vpack.c.bf16 %v199_v45, %v198_v44  ;;  %v200_v48 = vld [vmem:[#allocation3 + $0x70] sm:$0xff]  ;;  %v201_v49 = vld [vmem:[#allocation3 + $0x78] sm:$0xff]  ;;  %v41_v51 = vld [vmem:[%s2019_s0 + $0x8] sm:$0xff] }
  0x1e   :  { %v1816_v50 = vpack.c.bf16 %v201_v49, %v200_v48  ;;  %v38_v52 = vld [vmem:[%s2023_s4] sm:$0xff]  ;;  %v42_v53 = vld [vmem:[%s2019_s0 + $0x10] sm:$0xff]  ;;  %v43_v54 = vld [vmem:[%s2019_s0 + $0x18] sm:$0xff] }
  0x1f   :  { %1428 = vmatpush3.bf16.msra.mxu0 %v1425_v15  ;;  %v44_v55 = vld [vmem:[%s2019_s0 + $0x20] sm:$0xff]  ;;  %v45_v56 = vld [vmem:[%s2019_s0 + $0x28] sm:$0xff]  ;;  %v46_v57 = vld [vmem:[%s2019_s0 + $0x30] sm:$0xff] }
  0x20   :  { %1430 = vmatprep.subr.bf16.mxu0 %v1429_v22  ;;  %1457 = vmatpush3.bf16.msra.mxu1 %v1775_v24  ;;  %v47_v58 = vld [vmem:[%s2019_s0 + $0x38] sm:$0xff]  ;;  %v1885_v59 = vld [vmem:[%s2021_s2] ss:$0 sm:$0xff] }
  0x21   :  { %1458 = vmatprep.subr.bf16.mxu1 %v1690_v0 }
  0x23   :  { %1432 = vmatpush3.bf16.msra.mxu0 %v1429_v22 }
  0x24   :  { %1434 = vmatprep.subr.bf16.mxu0 %v1433_v28  ;;  %1460 = vmatpush3.bf16.msra.mxu1 %v1785_v30 }
  0x25   :  { %1461 = vmatprep.subr.bf16.mxu1 %v1690_v0 }
  0x27   :  { %1436 = vmatpush3.bf16.msra.mxu0 %v1433_v28 }
  0x28   :  { %1438 = vmatprep.subr.bf16.mxu0 %v1437_v34  ;;  %1463 = vmatpush3.bf16.msra.mxu1 %v1795_v36 }
  0x29   :  { %1464 = vmatprep.subr.bf16.mxu1 %v1690_v0 }
  0x2b   :  { %1440 = vmatpush3.bf16.msra.mxu0 %v1437_v34 }
  0x2c   :  { %1442 = vmatprep.subr.bf16.mxu0 %v1441_v40  ;;  %1466 = vmatpush3.bf16.msra.mxu1 %v1805_v42 }
  0x2d   :  { %1467 = vmatprep.subr.bf16.mxu1 %v1690_v0 }
  0x2f   :  { %1444 = vmatpush3.bf16.msra.mxu0 %v1441_v40 }
  0x30   :  { %1446 = vmatprep.subr.bf16.mxu0 %v1445_v46  ;;  %1469 = vmatpush3.bf16.msra.mxu1 %v1812_v47 }
  0x31   :  { %1470 = vmatprep.subr.bf16.mxu1 %v1690_v0 }
  0x33   :  { %1448 = vmatpush3.bf16.msra.mxu0 %v1445_v46 }
  0x34   :  { %1472 = vmatpush3.bf16.msra.mxu1 %v1816_v50  ;;  %1473 = vmatprep.subr.bf16.mxu0 %v1690_v0 }
  0x35   :  { %1497 = vmatprep.subr.bf16.mxu1 %v1690_v0 }
  0x36   :  { %1126 = vmatmul.mubr.f32.vlgmr.msra.gmra.mrb[0].mxu0 %v41_v51 }
  0x37   :  { %1170 = vmatmul.mubr.f32.vlgmr.msra.gmra.mrb[0].mxu1 %v38_v52  ;;  %1475 = vmatpush3.bf16.msra.mxu0 %v1756_v12 }
  0x38   :  { %1476 = vmatprep.subr.bf16.mxu0 %v1690_v0  ;;  %1499 = vmatpush3.bf16.msra.mxu1 %v1756_v12 }
  0x39   :  { %1500 = vmatprep.subr.bf16.mxu1 %v1690_v0  ;;  %1239 = vmatprep.mubr.msk.f32.mxu1 %vm1691_vm0, %v1692_v1 }
  0x3a   :  { %1128 = vmatprep.mubr.f32.mxu0 %v42_v53 }
  0x3b   :  { %1478 = vmatpush3.bf16.msra.mxu0 %v1762_v17 }
  0x3c   :  { %1479 = vmatprep.subr.bf16.mxu0 %v1690_v0  ;;  %1502 = vmatpush3.bf16.msra.mxu1 %v1762_v17 }
  0x3d   :  { %1503 = vmatprep.subr.bf16.mxu1 %v1690_v0  ;;  %1129 = vmatmul.mubr.f32.gmra.mrb[2].mxu0 %v43_v54 }
  0x3e   :  { %1131 = vmatprep.mubr.f32.mxu0 %v44_v55 }
  0x3f   :  { %1481 = vmatpush3.bf16.msra.mxu0 %v1775_v24 }
  0x40   :  { %1482 = vmatprep.subr.bf16.mxu0 %v1690_v0  ;;  %1505 = vmatpush3.bf16.msra.mxu1 %v1775_v24 }
  0x41   :  { %1506 = vmatprep.subr.bf16.mxu1 %v1690_v0  ;;  %1132 = vmatmul.mubr.f32.gmra.mrb[4].mxu0 %v45_v56 }
  0x42   :  { %1134 = vmatprep.mubr.f32.mxu0 %v46_v57 }
  0x43   :  { %1484 = vmatpush3.bf16.msra.mxu0 %v1785_v30 }
  0x44   :  { %1485 = vmatprep.subr.bf16.mxu0 %v1690_v0  ;;  %1508 = vmatpush3.bf16.msra.mxu1 %v1785_v30 }
  0x45   :  { %1509 = vmatprep.subr.bf16.mxu1 %v1690_v0  ;;  %1135 = vmatmul.mubr.f32.gmra.mrb[6].mxu0 %v47_v58 }
  0x46   :  { %1204 = vmatprep.mubr.msk.f32.mxu0 %vm1691_vm0, %v1692_v1 }
  0x47   :  { %1487 = vmatpush3.bf16.msra.mxu0 %v1795_v36 }
  0x48   :  { %1488 = vmatprep.subr.bf16.mxu0 %v1690_v0  ;;  %1511 = vmatpush3.bf16.msra.mxu1 %v1795_v36 }
  0x49   :  { %1512 = vmatprep.subr.bf16.mxu1 %v1690_v0 }
  0x4b   :  { %1490 = vmatpush3.bf16.msra.mxu0 %v1805_v42 }
  0x4c   :  { %1491 = vmatprep.subr.bf16.mxu0 %v1690_v0  ;;  %1514 = vmatpush3.bf16.msra.mxu1 %v1805_v42 }
  0x4d   :  { %1515 = vmatprep.subr.bf16.mxu1 %v1690_v0 }
  0x4f   :  { %1493 = vmatpush3.bf16.msra.mxu0 %v1812_v47 }
  0x50   :  { %1494 = vmatprep.subr.bf16.mxu0 %v1690_v0  ;;  %1517 = vmatpush3.bf16.msra.mxu1 %v1812_v47 }
  0x51   :  { %1518 = vmatprep.subr.bf16.mxu1 %v1690_v0 }
  0x53   :  { %1496 = vmatpush3.bf16.msra.mxu0 %v1816_v50 }
  0x54   :  { %1520 = vmatpush3.bf16.msra.mxu1 %v1816_v50  ;;  %1521 = vmatprep.subr.bf16.mxu0 %v1690_v0 }
  0x55   :  { %1545 = vmatprep.subr.bf16.mxu1 %v1690_v0 }
 0x109   :  { %v1127_v60 = vpop.f32.mrb[0].mxu0 }
 0x10a   :  { %v137_v61 = vpop.f32.mrb[1].mxu0  ;;  %v268_v62 = vpop.f32.mrb[0].mxu1  ;;  %v143_v11 = vadd.f32 %v1127_v60, %v1885_v59 }
 0x10b   :  { %v138_v63 = vadd.f32 %v1885_v59, %v137_v61  ;;  %v1171_v2 = vpop.f32.mrb[1].mxu1 }
 0x10d   :  { %v272_v3 = vadd.f32 %v268_v62, %v138_v63 }
 0x10f   :  { %1647 = vtanh.f32 %v272_v3 }
 0x110   :  { %v1130_v5 = vpop.f32.mrb[2].mxu0 }
 0x111   :  { %v147_v6 = vpop.f32.mrb[3].mxu0  ;;  %v153_v23 = vadd.f32 %v1130_v5, %v1885_v59 }
 0x112   :  { %v148_v18 = vadd.f32 %v1885_v59, %v147_v6 }
 0x114   :  { %v1909_v7 = vpop.f32.mrb[4].mxu0 }
 0x115   :  { %v1911_v8 = vpop.f32.mrb[5].mxu0 }
 0x116   :  { %v158_v29 = vadd.f32 %v1885_v59, %v1911_v8 }
 0x118   :  { %v1913_v9 = vpop.f32.mrb[6].mxu0 }
 0x119   :  { %v1648_v4 = vpop.eup %1647  ;;  %v1915_v10 = vpop.f32.mrb[7].mxu0  ;;  %v173_v39 = vadd.f32 %v1913_v9, %v1885_v59 }
 0x11a   :  { %274 = vst [vmem:[%s2024_s5] sm:$0xff] %v1648_v4  ;;  %1205 = vmatmul.mubr.f32.vlgmr.msra.gmra.mrb[8].mxu0 %v1648_v4  ;;  %v168_v35 = vadd.f32 %v1885_v59, %v1915_v10 }
 0x11b   :  { %1523 = vmatpush3.bf16.msra.mxu0 %v1756_v12  ;;  %1274 = vmatprep.mubr.msk.f32.mxu0 %vm1691_vm0, %v1692_v1 }
 0x11c   :  { %1524 = vmatprep.subr.bf16.mxu0 %v1690_v0 }
 0x11f   :  { %1526 = vmatpush3.bf16.msra.mxu0 %v1762_v17 }
 0x120   :  { %1527 = vmatprep.subr.bf16.mxu0 %v1690_v0 }
 0x123   :  { %1529 = vmatpush3.bf16.msra.mxu0 %v1775_v24 }
 0x124   :  { %1530 = vmatprep.subr.bf16.mxu0 %v1690_v0 }
 0x127   :  { %1532 = vmatpush3.bf16.msra.mxu0 %v1785_v30 }
 0x128   :  { %1533 = vmatprep.subr.bf16.mxu0 %v1690_v0 }
 0x12b   :  { %1535 = vmatpush3.bf16.msra.mxu0 %v1795_v36 }
 0x12c   :  { %1536 = vmatprep.subr.bf16.mxu0 %v1690_v0 }
 0x12f   :  { %1538 = vmatpush3.bf16.msra.mxu0 %v1805_v42 }
 0x130   :  { %1539 = vmatprep.subr.bf16.mxu0 %v1690_v0 }
 0x133   :  { %1541 = vmatpush3.bf16.msra.mxu0 %v1812_v47 }
 0x134   :  { %1542 = vmatprep.subr.bf16.mxu0 %v1690_v0 }
 0x137   :  { %1544 = vmatpush3.bf16.msra.mxu0 %v1816_v50 }
 0x138   :  { %1569 = vmatprep.subr.bf16.mxu0 %v1690_v0 }
 0x1ed   :  { %v359_v13 = vpop.f32.mrb[8].mxu0 }
 0x1ee   :  { %v363_v14 = vadd.f32 %v359_v13, %v143_v11  ;;  %v1206_v15 = vpop.f32.mrb[9].mxu0 }
 0x1f0   :  { %1649 = vtanh.f32 %v363_v14 }
 0x1fa   :  { %v1650_v16 = vpop.eup %1649 }
 0x1fb   :  { %920 = vst [vmem:[%s2024_s5 + $0x8] sm:$0xff] %v1650_v16  ;;  %1240 = vmatmul.mubr.f32.vlgmr.msra.gmra.mrb[2].mxu1 %v1650_v16 }
 0x1fc   :  { %1547 = vmatpush3.bf16.msra.mxu1 %v1756_v12  ;;  %1309 = vmatprep.mubr.msk.f32.mxu1 %vm1691_vm0, %v1692_v1 }
 0x1fd   :  { %1548 = vmatprep.subr.bf16.mxu1 %v1690_v0 }
 0x200   :  { %1550 = vmatpush3.bf16.msra.mxu1 %v1762_v17 }
 0x201   :  { %1551 = vmatprep.subr.bf16.mxu1 %v1690_v0 }
 0x204   :  { %1553 = vmatpush3.bf16.msra.mxu1 %v1775_v24 }
 0x205   :  { %1554 = vmatprep.subr.bf16.mxu1 %v1690_v0 }
 0x208   :  { %1556 = vmatpush3.bf16.msra.mxu1 %v1785_v30 }
 0x209   :  { %1557 = vmatprep.subr.bf16.mxu1 %v1690_v0 }
 0x20c   :  { %1559 = vmatpush3.bf16.msra.mxu1 %v1795_v36 }
 0x20d   :  { %1560 = vmatprep.subr.bf16.mxu1 %v1690_v0 }
 0x210   :  { %1562 = vmatpush3.bf16.msra.mxu1 %v1805_v42 }
 0x211   :  { %1563 = vmatprep.subr.bf16.mxu1 %v1690_v0 }
 0x214   :  { %1565 = vmatpush3.bf16.msra.mxu1 %v1812_v47 }
 0x215   :  { %1566 = vmatprep.subr.bf16.mxu1 %v1690_v0 }
 0x218   :  { %1568 = vmatpush3.bf16.msra.mxu1 %v1816_v50 }
 0x219   :  { %1593 = vmatprep.subr.bf16.mxu1 %v1690_v0 }
 0x2ce   :  { %v450_v19 = vpop.f32.mrb[2].mxu1 }
 0x2cf   :  { %v454_v20 = vadd.f32 %v450_v19, %v148_v18  ;;  %v1241_v21 = vpop.f32.mrb[3].mxu1 }
 0x2d1   :  { %1651 = vtanh.f32 %v454_v20 }
 0x2db   :  { %v1652_v22 = vpop.eup %1651 }
 0x2dc   :  { %922 = vst [vmem:[%s2024_s5 + $0x10] sm:$0xff] %v1652_v22  ;;  %1275 = vmatmul.mubr.f32.vlgmr.msra.gmra.mrb[10].mxu0 %v1652_v22 }
 0x2dd   :  { %1571 = vmatpush3.bf16.msra.mxu0 %v1756_v12  ;;  %1344 = vmatprep.mubr.msk.f32.mxu0 %vm1691_vm0, %v1692_v1 }
 0x2de   :  { %1572 = vmatprep.subr.bf16.mxu0 %v1690_v0 }
 0x2e1   :  { %1574 = vmatpush3.bf16.msra.mxu0 %v1762_v17 }
 0x2e2   :  { %1575 = vmatprep.subr.bf16.mxu0 %v1690_v0 }
 0x2e5   :  { %1577 = vmatpush3.bf16.msra.mxu0 %v1775_v24 }
 0x2e6   :  { %1578 = vmatprep.subr.bf16.mxu0 %v1690_v0 }
 0x2e9   :  { %1580 = vmatpush3.bf16.msra.mxu0 %v1785_v30 }
 0x2ea   :  { %1581 = vmatprep.subr.bf16.mxu0 %v1690_v0 }
 0x2ed   :  { %1583 = vmatpush3.bf16.msra.mxu0 %v1795_v36 }
 0x2ee   :  { %1584 = vmatprep.subr.bf16.mxu0 %v1690_v0 }
 0x2f1   :  { %1586 = vmatpush3.bf16.msra.mxu0 %v1805_v42 }
 0x2f2   :  { %1587 = vmatprep.subr.bf16.mxu0 %v1690_v0 }
 0x2f5   :  { %1589 = vmatpush3.bf16.msra.mxu0 %v1812_v47 }
 0x2f6   :  { %1590 = vmatprep.subr.bf16.mxu0 %v1690_v0 }
 0x2f9   :  { %1592 = vmatpush3.bf16.msra.mxu0 %v1816_v50 }
 0x2fa   :  { %1617 = vmatprep.subr.bf16.mxu0 %v1690_v0 }
 0x3af   :  { %v541_v25 = vpop.f32.mrb[10].mxu0 }
 0x3b0   :  { %v545_v26 = vadd.f32 %v541_v25, %v153_v23  ;;  %v1276_v27 = vpop.f32.mrb[11].mxu0 }
 0x3b2   :  { %1653 = vtanh.f32 %v545_v26 }
 0x3bc   :  { %v1654_v28 = vpop.eup %1653 }
 0x3bd   :  { %924 = vst [vmem:[%s2024_s5 + $0x18] sm:$0xff] %v1654_v28  ;;  %1310 = vmatmul.mubr.f32.vlgmr.msra.gmra.mrb[4].mxu1 %v1654_v28 }
 0x3be   :  { %1595 = vmatpush3.bf16.msra.mxu1 %v1756_v12  ;;  %1379 = vmatprep.mubr.msk.f32.mxu1 %vm1691_vm0, %v1692_v1 }
 0x3bf   :  { %1596 = vmatprep.subr.bf16.mxu1 %v1690_v0 }
 0x3c2   :  { %1598 = vmatpush3.bf16.msra.mxu1 %v1762_v17 }
 0x3c3   :  { %1599 = vmatprep.subr.bf16.mxu1 %v1690_v0 }
 0x3c6   :  { %1601 = vmatpush3.bf16.msra.mxu1 %v1775_v24 }
 0x3c7   :  { %1602 = vmatprep.subr.bf16.mxu1 %v1690_v0 }
 0x3ca   :  { %1604 = vmatpush3.bf16.msra.mxu1 %v1785_v30 }
 0x3cb   :  { %1605 = vmatprep.subr.bf16.mxu1 %v1690_v0 }
 0x3ce   :  { %1607 = vmatpush3.bf16.msra.mxu1 %v1795_v36 }
 0x3cf   :  { %1608 = vmatprep.subr.bf16.mxu1 %v1690_v0 }
 0x3d2   :  { %1610 = vmatpush3.bf16.msra.mxu1 %v1805_v42 }
 0x3d3   :  { %1611 = vmatprep.subr.bf16.mxu1 %v1690_v0 }
 0x3d6   :  { %1613 = vmatpush3.bf16.msra.mxu1 %v1812_v47 }
 0x3d7   :  { %1614 = vmatprep.subr.bf16.mxu1 %v1690_v0 }
 0x3da   :  { %1616 = vmatpush3.bf16.msra.mxu1 %v1816_v50 }
 0x490   :  { %v632_v31 = vpop.f32.mrb[4].mxu1 }
 0x491   :  { %v636_v32 = vadd.f32 %v632_v31, %v158_v29  ;;  %v1311_v33 = vpop.f32.mrb[5].mxu1 }
 0x493   :  { %1655 = vtanh.f32 %v636_v32 }
 0x49d   :  { %v1656_v34 = vpop.eup %1655 }
 0x49e   :  { %926 = vst [vmem:[%s2024_s5 + $0x20] sm:$0xff] %v1656_v34  ;;  %1345 = vmatmul.mubr.f32.vlgmr.msra.gmra.mrb[12].mxu0 %v1656_v34 }
 0x49f   :  { %1619 = vmatpush3.bf16.msra.mxu0 %v1756_v12  ;;  %1414 = vmatprep.mubr.msk.f32.mxu0 %vm1691_vm0, %v1692_v1  ;;  %v163_v1 = vadd.f32 %v1909_v7, %v1885_v59 }
 0x4a0   :  { %1620 = vmatprep.subr.bf16.mxu0 %v1690_v0 }
 0x4a3   :  { %1622 = vmatpush3.bf16.msra.mxu0 %v1762_v17 }
 0x4a4   :  { %1623 = vmatprep.subr.bf16.mxu0 %v1690_v0 }
 0x4a7   :  { %1625 = vmatpush3.bf16.msra.mxu0 %v1775_v24 }
 0x4a8   :  { %1626 = vmatprep.subr.bf16.mxu0 %v1690_v0 }
 0x4ab   :  { %1628 = vmatpush3.bf16.msra.mxu0 %v1785_v30 }
 0x4ac   :  { %1629 = vmatprep.subr.bf16.mxu0 %v1690_v0 }
 0x4af   :  { %1631 = vmatpush3.bf16.msra.mxu0 %v1795_v36 }
 0x4b0   :  { %1632 = vmatprep.subr.bf16.mxu0 %v1690_v0 }
 0x4b3   :  { %1634 = vmatpush3.bf16.msra.mxu0 %v1805_v42 }
 0x4b4   :  { %1635 = vmatprep.subr.bf16.mxu0 %v1690_v0 }
 0x4b7   :  { %1637 = vmatpush3.bf16.msra.mxu0 %v1812_v47 }
 0x4b8   :  { %1638 = vmatprep.subr.bf16.mxu0 %v1690_v0 }
 0x4bb   :  { %1640 = vmatpush3.bf16.msra.mxu0 %v1816_v50 }
 0x571   :  { %v723_v12 = vpop.f32.mrb[12].mxu0 }
 0x572   :  { %v727_v17 = vadd.f32 %v723_v12, %v163_v1  ;;  %v1346_v24 = vpop.f32.mrb[13].mxu0 }
 0x574   :  { %1657 = vtanh.f32 %v727_v17 }
 0x57e   :  { %v1658_v30 = vpop.eup %1657 }
 0x57f   :  { %928 = vst [vmem:[%s2024_s5 + $0x28] sm:$0xff] %v1658_v30  ;;  %1380 = vmatmul.mubr.f32.vlgmr.msra.gmra.mrb[6].mxu1 %v1658_v30 }
 0x652   :  { %v814_v36 = vpop.f32.mrb[6].mxu1 }
 0x653   :  { %v818_v0 = vadd.f32 %v814_v36, %v168_v35  ;;  %v1381_v37 = vpop.f32.mrb[7].mxu1 }
 0x655   :  { %1659 = vtanh.f32 %v818_v0 }
 0x65f   :  { %v1660_v38 = vpop.eup %1659 }
 0x660   :  { %930 = vst [vmem:[%s2024_s5 + $0x30] sm:$0xff] %v1660_v38  ;;  %1415 = vmatmul.mubr.f32.vlgmr.msra.gmra.mrb[14].mxu0 %v1660_v38 }
 0x733   :  { %v905_v40 = vpop.f32.mrb[14].mxu0 }
 0x734   :  { %v909_v41 = vadd.f32 %v905_v40, %v173_v39  ;;  %v1416_v42 = vpop.f32.mrb[15].mxu0 }
 0x736   :  { %1661 = vtanh.f32 %v909_v41 }
 0x740   :  { %v1662_v43 = vpop.eup %1661 }
 0x741   :  { %932 = vst [vmem:[%s2024_s5 + $0x38] sm:$0xff] %v1662_v43 }
 0x742   :  { %917 = vsyncpa [#allocation4], 1 }

// kernel: rnn_forward.3
= control target key start
LH: loop header
LB: loop body
LE: loop exit
PB: predicated region body
PF: predicated region fallthrough
CT: control target
= control target key end

     0   :  { %v1882_v2 = vmov 0.0|0.0   ;;  %vm1883_vm0 = vmmov 0   ;;  %v1884_v4 = vmov 0.0   ;;  %s2328_s1 = inlined_call_operand.vmem [shape: f32[128,128], index: 1, kind: input, shape index: {}]   ;;  %s2329_s3 = inlined_call_operand.vmem [shape: f32[128,128], index: 3, kind: input, shape index: {}]   ;;  %s2330_s0 = inlined_call_operand.vmem [shape: f32[8,8,128], index: 0, kind: input, shape index: {}]   ;;  %s2331_s4 = inlined_call_operand.vmem [shape: f32[8,128], index: 4, kind: input, shape index: {}]   ;;  %s2332_s2 = inlined_call_operand.vmem [shape: f32[1,128], index: 2, kind: input, shape index: {}]   ;;  %s2333_s5 = inlined_call_operand.vmem [shape: f32[128,128], index: 5, kind: input, shape index: {}]   ;;  %s2334_s6 = inlined_call_operand.vmem [shape: f32[1,128], index: 6, kind: input, shape index: {}]   ;;  %s2335_s7 = inlined_call_operand.vmem [shape: f32[8,8,128], index: 7, kind: output, shape index: {}]  }
   0x1   :  { %v40_v0 = vld [vmem:[%s2328_s1] sm:$0xff]  ;;  %v41_v1 = vld [vmem:[%s2328_s1 + $0x8] sm:$0xff]  ;;  %1639 = vmatprep.subr.bf16.mxu1 %v1882_v2  ;;  %1315 = vmatprep.mubr.msk.f32.mxu1 %vm1883_vm0, %v1884_v4  ;;  %v42_v7 = vld [vmem:[%s2328_s1 + $0x10] sm:$0xff] }
   0x2   :  { %v178_v3 = vld [vmem:[%s2329_s3] sm:$0xff]  ;;  %v1607_v5 = vpack.c.bf16 %v41_v1, %v40_v0  ;;  %v179_v6 = vld [vmem:[%s2329_s3 + $0x8] sm:$0xff]  ;;  %v43_v8 = vld [vmem:[%s2328_s1 + $0x18] sm:$0xff] }
   0x3   :  { %v1946_v9 = vpack.c.bf16 %v179_v6, %v178_v3  ;;  %v1611_v10 = vpack.c.bf16 %v43_v8, %v42_v7  ;;  %v180_v11 = vld [vmem:[%s2329_s3 + $0x10] sm:$0xff]  ;;  %v181_v12 = vld [vmem:[%s2329_s3 + $0x18] sm:$0xff]  ;;  %v44_v13 = vld [vmem:[%s2328_s1 + $0x20] sm:$0xff] }
   0x4   :  { %1608 = vmatprep.subr.bf16.mxu0 %v1607_v5  ;;  %v45_v14 = vld [vmem:[%s2328_s1 + $0x28] sm:$0xff]  ;;  %v1961_v15 = vpack.c.bf16 %v181_v12, %v180_v11  ;;  %v182_v17 = vld [vmem:[%s2329_s3 + $0x20] sm:$0xff]  ;;  %v46_v19 = vld [vmem:[%s2328_s1 + $0x30] sm:$0xff] }
   0x5   :  { %1610 = vmatpush3.bf16.msra.mxu0 %v1607_v5  ;;  %1641 = vmatpush3.bf16.msra.mxu1 %v1946_v9  ;;  %v1615_v16 = vpack.c.bf16 %v45_v14, %v44_v13  ;;  %v183_v18 = vld [vmem:[%s2329_s3 + $0x28] sm:$0xff]  ;;  %v47_v20 = vld [vmem:[%s2328_s1 + $0x38] sm:$0xff]  ;;  %v184_v23 = vld [vmem:[%s2329_s3 + $0x30] sm:$0xff] }
   0x6   :  { %1612 = vmatprep.subr.bf16.mxu0 %v1611_v10  ;;  %1642 = vmatprep.subr.bf16.mxu1 %v1882_v2  ;;  %v1977_v21 = vpack.c.bf16 %v183_v18, %v182_v17  ;;  %v1619_v22 = vpack.c.bf16 %v47_v20, %v46_v19  ;;  %v185_v24 = vld [vmem:[%s2329_s3 + $0x38] sm:$0xff]  ;;  %v48_v25 = vld [vmem:[%s2328_s1 + $0x40] sm:$0xff]  ;;  %v49_v26 = vld [vmem:[%s2328_s1 + $0x48] sm:$0xff] }
   0x7   :  { %v32_v27 = vld [vmem:[%s2330_s0] sm:$0xff]  ;;  %v1996_v28 = vpack.c.bf16 %v185_v24, %v184_v23  ;;  %v1623_v29 = vpack.c.bf16 %v49_v26, %v48_v25  ;;  %v187_v31 = vld [vmem:[%s2329_s3 + $0x48] sm:$0xff]  ;;  %v50_v32 = vld [vmem:[%s2328_s1 + $0x50] sm:$0xff] }
   0x8   :  { %1271 = vmatprep.mubr.f32.mxu0 %v32_v27  ;;  %v186_v30 = vld [vmem:[%s2329_s3 + $0x40] sm:$0xff]  ;;  %v51_v33 = vld [vmem:[%s2328_s1 + $0x58] sm:$0xff]  ;;  %v188_v36 = vld [vmem:[%s2329_s3 + $0x50] sm:$0xff] }
   0x9   :  { %1614 = vmatpush3.bf16.msra.mxu0 %v1611_v10  ;;  %1644 = vmatpush3.bf16.msra.mxu1 %v1961_v15  ;;  %v2012_v34 = vpack.c.bf16 %v187_v31, %v186_v30  ;;  %v1627_v35 = vpack.c.bf16 %v51_v33, %v50_v32  ;;  %v189_v37 = vld [vmem:[%s2329_s3 + $0x58] sm:$0xff]  ;;  %v52_v38 = vld [vmem:[%s2328_s1 + $0x60] sm:$0xff]  ;;  %v53_v39 = vld [vmem:[%s2328_s1 + $0x68] sm:$0xff] }
   0xa   :  { %1616 = vmatprep.subr.bf16.mxu0 %v1615_v16  ;;  %1645 = vmatprep.subr.bf16.mxu1 %v1882_v2  ;;  %v2028_v40 = vpack.c.bf16 %v189_v37, %v188_v36  ;;  %v1631_v41 = vpack.c.bf16 %v53_v39, %v52_v38  ;;  %v190_v42 = vld [vmem:[%s2329_s3 + $0x60] sm:$0xff]  ;;  %v191_v43 = vld [vmem:[%s2329_s3 + $0x68] sm:$0xff]  ;;  %v54_v44 = vld [vmem:[%s2328_s1 + $0x70] sm:$0xff] }
   0xb   :  { %v55_v45 = vld [vmem:[%s2328_s1 + $0x78] sm:$0xff]  ;;  %v2044_v46 = vpack.c.bf16 %v191_v43, %v190_v42  ;;  %v192_v48 = vld [vmem:[%s2329_s3 + $0x70] sm:$0xff]  ;;  %v33_v51 = vld [vmem:[%s2330_s0 + $0x8] sm:$0xff] }
   0xc   :  { %v1635_v47 = vpack.c.bf16 %v55_v45, %v54_v44  ;;  %v193_v49 = vld [vmem:[%s2329_s3 + $0x78] sm:$0xff]  ;;  %v30_v52 = vld [vmem:[%s2331_s4] sm:$0xff]  ;;  %v34_v53 = vld [vmem:[%s2330_s0 + $0x10] sm:$0xff] }
   0xd   :  { %1618 = vmatpush3.bf16.msra.mxu0 %v1615_v16  ;;  %1647 = vmatpush3.bf16.msra.mxu1 %v1977_v21  ;;  %v2054_v50 = vpack.c.bf16 %v193_v49, %v192_v48  ;;  %v35_v54 = vld [vmem:[%s2330_s0 + $0x18] sm:$0xff]  ;;  %v36_v55 = vld [vmem:[%s2330_s0 + $0x20] sm:$0xff]  ;;  %v37_v56 = vld [vmem:[%s2330_s0 + $0x28] sm:$0xff] }
   0xe   :  { %1620 = vmatprep.subr.bf16.mxu0 %v1619_v22  ;;  %1648 = vmatprep.subr.bf16.mxu1 %v1882_v2  ;;  %v38_v57 = vld [vmem:[%s2330_s0 + $0x30] sm:$0xff]  ;;  %v39_v58 = vld [vmem:[%s2330_s0 + $0x38] sm:$0xff]  ;;  %v2123_v59 = vld [vmem:[%s2332_s2] ss:$0 sm:$0xff] }
   0xf   :  { %v916_v37 = vld [vmem:[%s2333_s5 + $0x18] sm:$0xff]  ;;  %v919_v43 = vld [vmem:[%s2333_s5 + $0x30] sm:$0xff] }
  0x10   :  { %v920_v44 = vld [vmem:[%s2333_s5 + $0x38] sm:$0xff]  ;;  %v923_v49 = vld [vmem:[%s2333_s5 + $0x50] sm:$0xff] }
  0x11   :  { %1622 = vmatpush3.bf16.msra.mxu0 %v1619_v22  ;;  %1650 = vmatpush3.bf16.msra.mxu1 %v1996_v28  ;;  %v1843_v45 = vpack.c.bf16 %v920_v44, %v919_v43 }
  0x12   :  { %1624 = vmatprep.subr.bf16.mxu0 %v1623_v29  ;;  %1651 = vmatprep.subr.bf16.mxu1 %v1882_v2 }
  0x15   :  { %1626 = vmatpush3.bf16.msra.mxu0 %v1623_v29  ;;  %1653 = vmatpush3.bf16.msra.mxu1 %v2012_v34 }
  0x16   :  { %1628 = vmatprep.subr.bf16.mxu0 %v1627_v35  ;;  %1654 = vmatprep.subr.bf16.mxu1 %v1882_v2 }
  0x19   :  { %1630 = vmatpush3.bf16.msra.mxu0 %v1627_v35  ;;  %1656 = vmatpush3.bf16.msra.mxu1 %v2028_v40 }
  0x1a   :  { %1632 = vmatprep.subr.bf16.mxu0 %v1631_v41  ;;  %1657 = vmatprep.subr.bf16.mxu1 %v1882_v2 }
  0x1d   :  { %1634 = vmatpush3.bf16.msra.mxu0 %v1631_v41  ;;  %1659 = vmatpush3.bf16.msra.mxu1 %v2044_v46  ;;  %v918_v41 = vld [vmem:[%s2333_s5 + $0x28] sm:$0xff] }
  0x1e   :  { %1636 = vmatprep.subr.bf16.mxu0 %v1635_v47  ;;  %1660 = vmatprep.subr.bf16.mxu1 %v1882_v2 }
  0x21   :  { %1638 = vmatpush3.bf16.msra.mxu0 %v1635_v47  ;;  %1662 = vmatpush3.bf16.msra.mxu1 %v2054_v50  ;;  %v922_v47 = vld [vmem:[%s2333_s5 + $0x48] sm:$0xff] }
  0x22   :  { %1663 = vmatprep.subr.bf16.mxu0 %v1882_v2  ;;  %1687 = vmatprep.subr.bf16.mxu1 %v1882_v2 }
  0x24   :  { %1272 = vmatmul.mubr.f32.vlgmr.msra.gmra.mrb[0].mxu0 %v33_v51  ;;  %1316 = vmatmul.mubr.f32.vlgmr.msra.gmra.mrb[0].mxu1 %v30_v52  ;;  %v925_v52 = vld [vmem:[%s2333_s5 + $0x60] sm:$0xff] }
  0x25   :  { %1665 = vmatpush3.bf16.msra.mxu0 %v1946_v9  ;;  %1689 = vmatpush3.bf16.msra.mxu1 %v1946_v9 }
  0x26   :  { %1666 = vmatprep.subr.bf16.mxu0 %v1882_v2  ;;  %1690 = vmatprep.subr.bf16.mxu1 %v1882_v2 }
  0x27   :  { %1385 = vmatprep.mubr.msk.f32.mxu1 %vm1883_vm0, %v1884_v4  ;;  %1274 = vmatprep.mubr.f32.mxu0 %v34_v53  ;;  %v926_v53 = vld [vmem:[%s2333_s5 + $0x68] sm:$0xff] }
  0x28   :  { %1275 = vmatmul.mubr.f32.gmra.mrb[2].mxu0 %v35_v54  ;;  %v1855_v54 = vpack.c.bf16 %v926_v53, %v925_v52 }
  0x29   :  { %1668 = vmatpush3.bf16.msra.mxu0 %v1961_v15  ;;  %1692 = vmatpush3.bf16.msra.mxu1 %v1961_v15 }
  0x2a   :  { %1669 = vmatprep.subr.bf16.mxu0 %v1882_v2  ;;  %1693 = vmatprep.subr.bf16.mxu1 %v1882_v2 }
  0x2b   :  { %1277 = vmatprep.mubr.f32.mxu0 %v36_v55  ;;  %v927_v55 = vld [vmem:[%s2333_s5 + $0x70] sm:$0xff] }
  0x2c   :  { %1278 = vmatmul.mubr.f32.gmra.mrb[4].mxu0 %v37_v56  ;;  %v928_v56 = vld [vmem:[%s2333_s5 + $0x78] sm:$0xff] }
  0x2d   :  { %1671 = vmatpush3.bf16.msra.mxu0 %v1977_v21  ;;  %1695 = vmatpush3.bf16.msra.mxu1 %v1977_v21 }
  0x2e   :  { %1672 = vmatprep.subr.bf16.mxu0 %v1882_v2  ;;  %1696 = vmatprep.subr.bf16.mxu1 %v1882_v2 }
  0x2f   :  { %1280 = vmatprep.mubr.f32.mxu0 %v38_v57  ;;  %v1859_v57 = vpack.c.bf16 %v928_v56, %v927_v55 }
  0x30   :  { %1281 = vmatmul.mubr.f32.gmra.mrb[6].mxu0 %v39_v58 }
  0x31   :  { %1674 = vmatpush3.bf16.msra.mxu0 %v1996_v28  ;;  %1698 = vmatpush3.bf16.msra.mxu1 %v1996_v28 }
  0x32   :  { %1675 = vmatprep.subr.bf16.mxu0 %v1882_v2  ;;  %1699 = vmatprep.subr.bf16.mxu1 %v1882_v2 }
  0x33   :  { %1350 = vmatprep.mubr.msk.f32.mxu0 %vm1883_vm0, %v1884_v4 }
  0x35   :  { %1677 = vmatpush3.bf16.msra.mxu0 %v2012_v34  ;;  %1701 = vmatpush3.bf16.msra.mxu1 %v2012_v34 }
  0x36   :  { %1678 = vmatprep.subr.bf16.mxu0 %v1882_v2  ;;  %1702 = vmatprep.subr.bf16.mxu1 %v1882_v2 }
  0x39   :  { %1680 = vmatpush3.bf16.msra.mxu0 %v2028_v40  ;;  %1704 = vmatpush3.bf16.msra.mxu1 %v2028_v40 }
  0x3a   :  { %1681 = vmatprep.subr.bf16.mxu0 %v1882_v2  ;;  %1705 = vmatprep.subr.bf16.mxu1 %v1882_v2 }
  0x3d   :  { %1683 = vmatpush3.bf16.msra.mxu0 %v2044_v46  ;;  %1707 = vmatpush3.bf16.msra.mxu1 %v2044_v46 }
  0x3e   :  { %1684 = vmatprep.subr.bf16.mxu0 %v1882_v2  ;;  %1708 = vmatprep.subr.bf16.mxu1 %v1882_v2 }
  0x41   :  { %1686 = vmatpush3.bf16.msra.mxu0 %v2054_v50  ;;  %1710 = vmatpush3.bf16.msra.mxu1 %v2054_v50 }
  0x42   :  { %1711 = vmatprep.subr.bf16.mxu0 %v1882_v2  ;;  %1735 = vmatprep.subr.bf16.mxu1 %v1882_v2 }
  0xf7   :  { %v1273_v60 = vpop.f32.mrb[0].mxu0  ;;  %v260_v61 = vpop.f32.mrb[0].mxu1 }
  0xf8   :  { %v129_v62 = vpop.f32.mrb[1].mxu0  ;;  %v1317_v63 = vpop.f32.mrb[1].mxu1  ;;  %v135_v12 = vadd.f32 %v1273_v60, %v2123_v59 }
  0xf9   :  { %v130_v0 = vadd.f32 %v2123_v59, %v129_v62 }
  0xfb   :  { %v264_v1 = vadd.f32 %v260_v61, %v130_v0  ;;  %v1276_v5 = vpop.f32.mrb[2].mxu0  ;;  %v1054_v0 = vld [vmem:[%s2334_s6] ss:$0 sm:$0xff] }
  0xfc   :  { %v139_v6 = vpop.f32.mrb[3].mxu0  ;;  %v145_v24 = vadd.f32 %v1276_v5, %v2123_v59 }
  0xfd   :  { %1866 = vtanh.f32 %v264_v1  ;;  %v140_v18 = vadd.f32 %v2123_v59, %v139_v6 }
  0xff   :  { %v2147_v7 = vpop.f32.mrb[4].mxu0 }
 0x100   :  { %v2149_v8 = vpop.f32.mrb[5].mxu0 }
 0x101   :  { %v150_v30 = vadd.f32 %v2123_v59, %v2149_v8 }
 0x103   :  { %v2151_v10 = vpop.f32.mrb[6].mxu0 }
 0x104   :  { %v2153_v11 = vpop.f32.mrb[7].mxu0 }
 0x105   :  { %v160_v58 = vadd.f32 %v2123_v59, %v2153_v11 }
 0x107   :  { %v2126_v3 = vpop.eup %1866 }
 0x108   :  { %1351 = vmatmul.mubr.f32.vlgmr.msra.gmra.mrb[8].mxu0 %v2126_v3 }
 0x109   :  { %1713 = vmatpush3.bf16.msra.mxu0 %v1946_v9  ;;  %1420 = vmatprep.mubr.msk.f32.mxu0 %vm1883_vm0, %v1884_v4 }
 0x10a   :  { %1714 = vmatprep.subr.bf16.mxu0 %v1882_v2 }
 0x10d   :  { %1716 = vmatpush3.bf16.msra.mxu0 %v1961_v15 }
 0x10e   :  { %1717 = vmatprep.subr.bf16.mxu0 %v1882_v2 }
 0x111   :  { %1719 = vmatpush3.bf16.msra.mxu0 %v1977_v21 }
 0x112   :  { %1720 = vmatprep.subr.bf16.mxu0 %v1882_v2 }
 0x115   :  { %1722 = vmatpush3.bf16.msra.mxu0 %v1996_v28 }
 0x116   :  { %1723 = vmatprep.subr.bf16.mxu0 %v1882_v2 }
 0x119   :  { %1725 = vmatpush3.bf16.msra.mxu0 %v2012_v34 }
 0x11a   :  { %1726 = vmatprep.subr.bf16.mxu0 %v1882_v2 }
 0x11d   :  { %1728 = vmatpush3.bf16.msra.mxu0 %v2028_v40 }
 0x11e   :  { %1729 = vmatprep.subr.bf16.mxu0 %v1882_v2 }
 0x121   :  { %1731 = vmatpush3.bf16.msra.mxu0 %v2044_v46 }
 0x122   :  { %1732 = vmatprep.subr.bf16.mxu0 %v1882_v2 }
 0x125   :  { %1734 = vmatpush3.bf16.msra.mxu0 %v2054_v50 }
 0x126   :  { %1759 = vmatprep.subr.bf16.mxu0 %v1882_v2 }
 0x1db   :  { %v351_v13 = vpop.f32.mrb[8].mxu0 }
 0x1dc   :  { %v355_v14 = vadd.f32 %v351_v13, %v135_v12  ;;  %v1352_v16 = vpop.f32.mrb[9].mxu0 }
 0x1de   :  { %1868 = vtanh.f32 %v355_v14 }
 0x1e8   :  { %v2156_v17 = vpop.eup %1868 }
 0x1e9   :  { %1386 = vmatmul.mubr.f32.vlgmr.msra.gmra.mrb[2].mxu1 %v2156_v17 }
 0x1ea   :  { %1737 = vmatpush3.bf16.msra.mxu1 %v1946_v9  ;;  %1455 = vmatprep.mubr.msk.f32.mxu1 %vm1883_vm0, %v1884_v4 }
 0x1eb   :  { %1738 = vmatprep.subr.bf16.mxu1 %v1882_v2 }
 0x1ee   :  { %1740 = vmatpush3.bf16.msra.mxu1 %v1961_v15 }
 0x1ef   :  { %1741 = vmatprep.subr.bf16.mxu1 %v1882_v2 }
 0x1f2   :  { %1743 = vmatpush3.bf16.msra.mxu1 %v1977_v21 }
 0x1f3   :  { %1744 = vmatprep.subr.bf16.mxu1 %v1882_v2 }
 0x1f6   :  { %1746 = vmatpush3.bf16.msra.mxu1 %v1996_v28 }
 0x1f7   :  { %1747 = vmatprep.subr.bf16.mxu1 %v1882_v2 }
 0x1fa   :  { %1749 = vmatpush3.bf16.msra.mxu1 %v2012_v34 }
 0x1fb   :  { %1750 = vmatprep.subr.bf16.mxu1 %v1882_v2 }
 0x1fe   :  { %1752 = vmatpush3.bf16.msra.mxu1 %v2028_v40 }
 0x1ff   :  { %1753 = vmatprep.subr.bf16.mxu1 %v1882_v2 }
 0x202   :  { %1755 = vmatpush3.bf16.msra.mxu1 %v2044_v46 }
 0x203   :  { %1756 = vmatprep.subr.bf16.mxu1 %v1882_v2 }
 0x206   :  { %1758 = vmatpush3.bf16.msra.mxu1 %v2054_v50 }
 0x207   :  { %1783 = vmatprep.subr.bf16.mxu1 %v1882_v2 }
 0x2bc   :  { %v442_v19 = vpop.f32.mrb[2].mxu1 }
 0x2bd   :  { %v446_v20 = vadd.f32 %v442_v19, %v140_v18  ;;  %v1387_v22 = vpop.f32.mrb[3].mxu1  ;;  %v165_v18 = vadd.f32 %v2151_v10, %v2123_v59 }
 0x2bf   :  { %1870 = vtanh.f32 %v446_v20 }
 0x2c9   :  { %v2178_v23 = vpop.eup %1870 }
 0x2ca   :  { %1421 = vmatmul.mubr.f32.vlgmr.msra.gmra.mrb[10].mxu0 %v2178_v23 }
 0x2cb   :  { %1761 = vmatpush3.bf16.msra.mxu0 %v1946_v9  ;;  %1490 = vmatprep.mubr.msk.f32.mxu0 %vm1883_vm0, %v1884_v4 }
 0x2cc   :  { %1762 = vmatprep.subr.bf16.mxu0 %v1882_v2 }
 0x2cf   :  { %1764 = vmatpush3.bf16.msra.mxu0 %v1961_v15 }
 0x2d0   :  { %1765 = vmatprep.subr.bf16.mxu0 %v1882_v2 }
 0x2d3   :  { %1767 = vmatpush3.bf16.msra.mxu0 %v1977_v21 }
 0x2d4   :  { %1768 = vmatprep.subr.bf16.mxu0 %v1882_v2 }
 0x2d7   :  { %1770 = vmatpush3.bf16.msra.mxu0 %v1996_v28 }
 0x2d8   :  { %1771 = vmatprep.subr.bf16.mxu0 %v1882_v2 }
 0x2db   :  { %1773 = vmatpush3.bf16.msra.mxu0 %v2012_v34 }
 0x2dc   :  { %1774 = vmatprep.subr.bf16.mxu0 %v1882_v2 }
 0x2df   :  { %1776 = vmatpush3.bf16.msra.mxu0 %v2028_v40 }
 0x2e0   :  { %1777 = vmatprep.subr.bf16.mxu0 %v1882_v2 }
 0x2e3   :  { %1779 = vmatpush3.bf16.msra.mxu0 %v2044_v46 }
 0x2e4   :  { %1780 = vmatprep.subr.bf16.mxu0 %v1882_v2 }
 0x2e7   :  { %1782 = vmatpush3.bf16.msra.mxu0 %v2054_v50 }
 0x2e8   :  { %1807 = vmatprep.subr.bf16.mxu0 %v1882_v2 }
 0x39d   :  { %v533_v25 = vpop.f32.mrb[10].mxu0 }
 0x39e   :  { %v537_v26 = vadd.f32 %v533_v25, %v145_v24  ;;  %v1422_v27 = vpop.f32.mrb[11].mxu0 }
 0x3a0   :  { %1872 = vtanh.f32 %v537_v26 }
 0x3aa   :  { %v2200_v29 = vpop.eup %1872 }
 0x3ab   :  { %1456 = vmatmul.mubr.f32.vlgmr.msra.gmra.mrb[4].mxu1 %v2200_v29 }
 0x3ac   :  { %1785 = vmatpush3.bf16.msra.mxu1 %v1946_v9  ;;  %1525 = vmatprep.mubr.msk.f32.mxu1 %vm1883_vm0, %v1884_v4 }
 0x3ad   :  { %1786 = vmatprep.subr.bf16.mxu1 %v1882_v2 }
 0x3b0   :  { %1788 = vmatpush3.bf16.msra.mxu1 %v1961_v15 }
 0x3b1   :  { %1789 = vmatprep.subr.bf16.mxu1 %v1882_v2 }
 0x3b4   :  { %1791 = vmatpush3.bf16.msra.mxu1 %v1977_v21 }
 0x3b5   :  { %1792 = vmatprep.subr.bf16.mxu1 %v1882_v2 }
 0x3b8   :  { %1794 = vmatpush3.bf16.msra.mxu1 %v1996_v28 }
 0x3b9   :  { %1795 = vmatprep.subr.bf16.mxu1 %v1882_v2 }
 0x3bc   :  { %1797 = vmatpush3.bf16.msra.mxu1 %v2012_v34 }
 0x3bd   :  { %1798 = vmatprep.subr.bf16.mxu1 %v1882_v2 }
 0x3c0   :  { %1800 = vmatpush3.bf16.msra.mxu1 %v2028_v40 }
 0x3c1   :  { %1801 = vmatprep.subr.bf16.mxu1 %v1882_v2 }
 0x3c4   :  { %1803 = vmatpush3.bf16.msra.mxu1 %v2044_v46 }
 0x3c5   :  { %1804 = vmatprep.subr.bf16.mxu1 %v1882_v2 }
 0x3c8   :  { %1806 = vmatpush3.bf16.msra.mxu1 %v2054_v50 }
 0x47e   :  { %v624_v31 = vpop.f32.mrb[4].mxu1 }
 0x47f   :  { %v628_v32 = vadd.f32 %v624_v31, %v150_v30  ;;  %v1457_v33 = vpop.f32.mrb[5].mxu1 }
 0x481   :  { %1874 = vtanh.f32 %v628_v32 }
 0x48b   :  { %v2222_v35 = vpop.eup %1874 }
 0x48c   :  { %1491 = vmatmul.mubr.f32.vlgmr.msra.gmra.mrb[12].mxu0 %v2222_v35 }
 0x48d   :  { %1809 = vmatpush3.bf16.msra.mxu0 %v1946_v9  ;;  %1560 = vmatprep.mubr.msk.f32.mxu0 %vm1883_vm0, %v1884_v4  ;;  %v913_v4 = vld [vmem:[%s2333_s5] sm:$0xff]  ;;  %v914_v9 = vld [vmem:[%s2333_s5 + $0x8] sm:$0xff] }
 0x48e   :  { %1810 = vmatprep.subr.bf16.mxu0 %v1882_v2 }
 0x491   :  { %1812 = vmatpush3.bf16.msra.mxu0 %v1961_v15  ;;  %v1831_v15 = vpack.c.bf16 %v914_v9, %v913_v4 }
 0x492   :  { %1813 = vmatprep.subr.bf16.mxu0 %v1882_v2 }
 0x493   :  { %1832 = vmatprep.subr.bf16.mxu1 %v1831_v15 }
 0x495   :  { %1815 = vmatpush3.bf16.msra.mxu0 %v1977_v21  ;;  %v155_v21 = vadd.f32 %v2147_v7, %v2123_v59 }
 0x496   :  { %1816 = vmatprep.subr.bf16.mxu0 %v1882_v2 }
 0x499   :  { %1818 = vmatpush3.bf16.msra.mxu0 %v1996_v28 }
 0x49a   :  { %1819 = vmatprep.subr.bf16.mxu0 %v1882_v2 }
 0x49d   :  { %1821 = vmatpush3.bf16.msra.mxu0 %v2012_v34 }
 0x49e   :  { %1822 = vmatprep.subr.bf16.mxu0 %v1882_v2 }
 0x4a1   :  { %1824 = vmatpush3.bf16.msra.mxu0 %v2028_v40  ;;  %v917_v40 = vld [vmem:[%s2333_s5 + $0x20] sm:$0xff] }
 0x4a2   :  { %1825 = vmatprep.subr.bf16.mxu0 %v1882_v2  ;;  %v1839_v42 = vpack.c.bf16 %v918_v41, %v917_v40 }
 0x4a5   :  { %1827 = vmatpush3.bf16.msra.mxu0 %v2044_v46  ;;  %v921_v46 = vld [vmem:[%s2333_s5 + $0x40] sm:$0xff] }
 0x4a6   :  { %1828 = vmatprep.subr.bf16.mxu0 %v1882_v2  ;;  %v915_v2 = vld [vmem:[%s2333_s5 + $0x10] sm:$0xff]  ;;  %v1847_v48 = vpack.c.bf16 %v922_v47, %v921_v46 }
 0x4a7   :  { %v1835_v38 = vpack.c.bf16 %v916_v37, %v915_v2 }
 0x4a9   :  { %1830 = vmatpush3.bf16.msra.mxu0 %v2054_v50  ;;  %v924_v50 = vld [vmem:[%s2333_s5 + $0x58] sm:$0xff] }
 0x4aa   :  { %v1851_v51 = vpack.c.bf16 %v924_v50, %v923_v49 }
 0x55f   :  { %v715_v28 = vpop.f32.mrb[12].mxu0 }
 0x560   :  { %v719_v34 = vadd.f32 %v715_v28, %v155_v21  ;;  %v1492_v36 = vpop.f32.mrb[13].mxu0 }
 0x562   :  { %1876 = vtanh.f32 %v719_v34 }
 0x56c   :  { %v1877_v39 = vpop.eup %1876 }
 0x56d   :  { %1526 = vmatmul.mubr.f32.vlgmr.msra.gmra.mrb[6].mxu1 %v1877_v39 }
 0x56e   :  { %1834 = vmatpush3.bf16.msra.mxu1 %v1831_v15  ;;  %1595 = vmatprep.mubr.f32.mxu1 %v2126_v3 }
 0x56f   :  { %1836 = vmatprep.subr.bf16.mxu1 %v1835_v38 }
 0x572   :  { %1838 = vmatpush3.bf16.msra.mxu1 %v1835_v38 }
 0x573   :  { %1840 = vmatprep.subr.bf16.mxu1 %v1839_v42 }
 0x576   :  { %1842 = vmatpush3.bf16.msra.mxu1 %v1839_v42 }
 0x577   :  { %1844 = vmatprep.subr.bf16.mxu1 %v1843_v45 }
 0x57a   :  { %1846 = vmatpush3.bf16.msra.mxu1 %v1843_v45 }
 0x57b   :  { %1848 = vmatprep.subr.bf16.mxu1 %v1847_v48 }
 0x57e   :  { %1850 = vmatpush3.bf16.msra.mxu1 %v1847_v48 }
 0x57f   :  { %1852 = vmatprep.subr.bf16.mxu1 %v1851_v51 }
 0x582   :  { %1854 = vmatpush3.bf16.msra.mxu1 %v1851_v51 }
 0x583   :  { %1856 = vmatprep.subr.bf16.mxu1 %v1855_v54 }
 0x586   :  { %1858 = vmatpush3.bf16.msra.mxu1 %v1855_v54 }
 0x587   :  { %1860 = vmatprep.subr.bf16.mxu1 %v1859_v57 }
 0x58a   :  { %1862 = vmatpush3.bf16.msra.mxu1 %v1859_v57 }
 0x58d   :  { %1596 = vmatmul.mubr.f32.vlgmr.msra.gmra.mrb[8].mxu1 %v2156_v17 }
 0x58e   :  { %1598 = vmatprep.mubr.f32.mxu1 %v2178_v23 }
 0x591   :  { %1599 = vmatmul.mubr.f32.gmra.mrb[10].mxu1 %v2200_v29 }
 0x592   :  { %1601 = vmatprep.mubr.f32.mxu1 %v2222_v35 }
 0x595   :  { %1602 = vmatmul.mubr.f32.gmra.mrb[12].mxu1 %v1877_v39 }
 0x640   :  { %v806_v60 = vpop.f32.mrb[6].mxu1 }
 0x641   :  { %v810_v61 = vadd.f32 %v806_v60, %v160_v58  ;;  %v1527_v62 = vpop.f32.mrb[7].mxu1 }
 0x643   :  { %1878 = vtanh.f32 %v810_v61 }
 0x64d   :  { %v1879_v63 = vpop.eup %1878 }
 0x64e   :  { %1561 = vmatmul.mubr.f32.vlgmr.msra.gmra.mrb[14].mxu0 %v1879_v63  ;;  %1604 = vmatprep.mubr.f32.mxu1 %v1879_v63 }
 0x660   :  { %v1597_v1 = vpop.f32.mrb[8].mxu1 }
 0x661   :  { %v1008_v3 = vadd.f32 %v1597_v1, %v1054_v0  ;;  %v1002_v5 = vpop.f32.mrb[9].mxu1 }
 0x662   :  { %v1003_v6 = vadd.f32 %v1054_v0, %v1002_v5 }
 0x663   :  { %1042 = vst [vmem:[%s2335_s7 + $0x8] sm:$0xff] %v1008_v3 }
 0x664   :  { %1041 = vst [vmem:[%s2335_s7] sm:$0xff] %v1003_v6  ;;  %v1600_v7 = vpop.f32.mrb[10].mxu1 }
 0x665   :  { %v1018_v8 = vadd.f32 %v1600_v7, %v1054_v0  ;;  %v1012_v11 = vpop.f32.mrb[11].mxu1 }
 0x666   :  { %v1013_v12 = vadd.f32 %v1054_v0, %v1012_v11 }
 0x667   :  { %1044 = vst [vmem:[%s2335_s7 + $0x18] sm:$0xff] %v1018_v8 }
 0x668   :  { %1043 = vst [vmem:[%s2335_s7 + $0x10] sm:$0xff] %v1013_v12  ;;  %v1603_v13 = vpop.f32.mrb[12].mxu1 }
 0x669   :  { %v1028_v14 = vadd.f32 %v1603_v13, %v1054_v0  ;;  %v1022_v16 = vpop.f32.mrb[13].mxu1 }
 0x66a   :  { %v1023_v17 = vadd.f32 %v1054_v0, %v1022_v16 }
 0x66b   :  { %1046 = vst [vmem:[%s2335_s7 + $0x28] sm:$0xff] %v1028_v14 }
 0x66c   :  { %1045 = vst [vmem:[%s2335_s7 + $0x20] sm:$0xff] %v1023_v17 }
 0x721   :  { %v897_v19 = vpop.f32.mrb[14].mxu0 }
 0x722   :  { %v901_v20 = vadd.f32 %v897_v19, %v165_v18  ;;  %v1562_v22 = vpop.f32.mrb[15].mxu0 }
 0x724   :  { %1880 = vtanh.f32 %v901_v20 }
 0x72e   :  { %v1881_v23 = vpop.eup %1880 }
 0x72f   :  { %1605 = vmatmul.mubr.f32.gmra.mrb[14].mxu1 %v1881_v23 }
 0x802   :  { %v1606_v24 = vpop.f32.mrb[14].mxu1 }
 0x803   :  { %v1038_v25 = vadd.f32 %v1606_v24, %v1054_v0  ;;  %v1032_v26 = vpop.f32.mrb[15].mxu1 }
 0x804   :  { %v1033_v27 = vadd.f32 %v1054_v0, %v1032_v26 }
 0x805   :  { %1048 = vst [vmem:[%s2335_s7 + $0x38] sm:$0xff] %v1038_v25 }
 0x806   :  { %1047 = vst [vmem:[%s2335_s7 + $0x30] sm:$0xff] %v1033_v27 }

</bundles_post_ra>
